<compile_context>
chip_gen: v5e
topology: v5e:2x2
jax: 0.10.0
libtpu: 0.0.40
codegen_flags: <defaults>
</compile_context>

<pallas_src>
import string
import functools

import jax
import jax.numpy as jnp
from jax.experimental import pallas as pl
from jax.experimental.pallas import tpu as pltpu


ALL_LETTERS = string.ascii_letters + " .,;'"
N_LETTERS = len(ALL_LETTERS)        # 57
N_HIDDEN = 128
# NOTE: the reference script has all_categories = [] (n_categories = 0), which
# is degenerate; we pick the classic 18-language classification head size.
OUTPUT_SIZE = 18


def _lstm_seq_kernel(x_ref, h0_ref, c0_ref,
                     w_ih_t_ref, w_hh_t_ref, bias_ref,
                     w_lin_t_ref, b_lin_ref,
                     logp_ref, h_out_ref, c_out_ref,
                     xg_ref, h_all_ref, h_ref, c_ref,
                     *, hidden_size, unroll):
    H = hidden_size
    S, TB, IN = x_ref.shape           # (seq, batch_tile, padded input)
    OUT_PAD = logp_ref.shape[-1]

    # ---- Phase 1: hoisted (non-recurrent) input projection, one MXU matmul ----
    # (S*TB, IN) @ (IN, 4H) -> (S*TB, 4H); bias (b_ih + b_hh) folded in here.
    x2 = x_ref[...].reshape(S * TB, IN).astype(jnp.bfloat16)
    xg = jnp.dot(x2, w_ih_t_ref[...], preferred_element_type=jnp.float32)
    xg_ref[...] = (xg + bias_ref[...]).reshape(S, TB, 4 * H).astype(xg_ref.dtype)

    # ---- Phase 2: serial recurrence; only h @ W_hh^T on the critical path ----
    h_ref[...] = h0_ref[...]
    c_ref[...] = c0_ref[...]

    def step(t, carry):
        h = h_ref[...]
        c = c_ref[...]
        gates = xg_ref[t].astype(jnp.float32) + jnp.dot(
            h.astype(jnp.bfloat16), w_hh_t_ref[...],
            preferred_element_type=jnp.float32)
        # Host permuted gate blocks to [i, f, o, g]: one sigmoid, one tanh.
        sig = jax.nn.sigmoid(gates[:, :3 * H])
        i_g = sig[:, 0 * H:1 * H]
        f_g = sig[:, 1 * H:2 * H]
        o_g = sig[:, 2 * H:3 * H]
        g_g = jnp.tanh(gates[:, 3 * H:4 * H])
        c_new = f_g * c + i_g * g_g
        h_new = o_g * jnp.tanh(c_new)
        h_ref[...] = h_new
        c_ref[...] = c_new
        h_all_ref[t] = h_new.astype(h_all_ref.dtype)
        return carry

    jax.lax.fori_loop(0, S, step, 0, unroll=unroll)

    # ---- Phase 3: classifier head + log-softmax for all timesteps at once ----
    hb = h_all_ref[...].reshape(S * TB, H)                      # bf16 already
    logits = jnp.dot(hb, w_lin_t_ref[...], preferred_element_type=jnp.float32)
    # Padded head lanes carry a -1e30 bias (their W_lin columns are exactly 0)
    # -> exp underflows to 0, so the normalizer only sees the real classes.
    logits = logits.reshape(S, TB, OUT_PAD) + b_lin_ref[...]
    m = jnp.max(logits, axis=-1, keepdims=True)
    z = logits - m
    lse = jnp.log(jnp.sum(jnp.exp(z), axis=-1, keepdims=True))
    logp_ref[...] = (z - lse).astype(logp_ref.dtype)

    h_out_ref[...] = h_ref[...].astype(h_out_ref.dtype)
    c_out_ref[...] = c_ref[...].astype(c_out_ref.dtype)


def _permute_gate_rows(w):
    """PyTorch gate-block order [i, f, g, o] -> [i, f, o, g] along axis 0."""
    i, f, g, o = jnp.split(w, 4, axis=0)
    return jnp.concatenate([i, f, o, g], axis=0)


@functools.partial(jax.jit, static_argnames=("tb",))
def lstm_forward(x, hidden, c, params, *, tb=None):
    """x: (seq, batch, input_size); hidden/c: (1, batch, H).

    Returns (log_probs (seq, batch, out), hn (1, batch, H), cn (1, batch, H)),
    i.e. the same semantics as LSTM.forward for an already-3D input.
    """
    S, B, IN = x.shape
    H = params["w_hh"].shape[1]
    OUT = params["w_lin"].shape[0]
    assert H % 128 == 0, "hidden size must be a multiple of 128 lanes"

    IN_PAD = max(128, -(-IN // 128) * 128)     # 57 -> 128 (lane-dense x, clean K)
    OUT_PAD = max(128, -(-OUT // 128) * 128)   # 18 -> 128 (lane-dense head/output)

    # Batch tile: bigger tiles -> fewer serial S-loops and better MXU row use;
    # tb=32 keeps the per-step f32 gates tensor at 16 vregs (no spills).
    B_PAD8 = -(-B // 8) * 8
    if tb is None:
        tb = min(32, B_PAD8)
    B_PAD = -(-B_PAD8 // tb) * tb

    f32, bf16 = jnp.float32, jnp.bfloat16

    # ---- host-side glue: pad / transpose / cast / gate-permute (outside kernel) ----
    x_p = jnp.zeros((S, B_PAD, IN_PAD), bf16).at[:, :B, :IN].set(x.astype(bf16))
    h_p = jnp.zeros((B_PAD, H), f32).at[:B].set(hidden.reshape(B, H).astype(f32))
    c_p = jnp.zeros((B_PAD, H), f32).at[:B].set(c.reshape(B, H).astype(f32))

    w_ih = _permute_gate_rows(params["w_ih"])                    # (4H, IN), [i,f,o,g]
    w_hh = _permute_gate_rows(params["w_hh"])                    # (4H, H)
    b_sum = _permute_gate_rows(params["b_ih"] + params["b_hh"])  # (4H,)

    w_ih_t = jnp.zeros((IN_PAD, 4 * H), bf16).at[:IN].set(w_ih.T.astype(bf16))
    w_hh_t = w_hh.T.astype(bf16)                                 # (H, 4H)
    bias = b_sum.reshape(1, 4 * H).astype(f32)                   # pre-summed
    w_lin_t = jnp.zeros((H, OUT_PAD), bf16).at[:, :OUT].set(params["w_lin"].T.astype(bf16))
    b_lin = jnp.full((1, OUT_PAD), -1e30, f32).at[0, :OUT].set(params["b_lin"].astype(f32))

    unroll = S if S <= 32 else 8
    kernel = functools.partial(_lstm_seq_kernel, hidden_size=H, unroll=unroll)

    # Explicit VMEM budget: resident weights + S-scaling scratch + double-buffered I/O.
    bytes_weights = IN_PAD * 4 * H * 2 + H * 4 * H * 2 + 4 * H * 4 + H * OUT_PAD * 2 + OUT_PAD * 4
    bytes_scratch = S * tb * 4 * H * 2 + S * tb * H * 2 + 2 * tb * H * 4
    bytes_io = 2 * (S * tb * IN_PAD * 2 + S * tb * OUT_PAD * 4 + 4 * tb * H * 4)
    vmem_limit = int(min(100 << 20,
                         max(32 << 20,
                             (bytes_weights + bytes_scratch + bytes_io) * 3 // 2 + (4 << 20))))

    logp_p, h_out, c_out = pl.pallas_call(
        kernel,
        out_shape=(
            jax.ShapeDtypeStruct((S, B_PAD, OUT_PAD), f32),
            jax.ShapeDtypeStruct((B_PAD, H), f32),
            jax.ShapeDtypeStruct((B_PAD, H), f32),
        ),
        grid_spec=pltpu.PrefetchScalarGridSpec(
            num_scalar_prefetch=0,
            grid=(B_PAD // tb,),
            in_specs=[
                pl.BlockSpec((S, tb, IN_PAD), lambda b: (0, b, 0)),   # x (bf16)
                pl.BlockSpec((tb, H), lambda b: (b, 0)),              # h0
                pl.BlockSpec((tb, H), lambda b: (b, 0)),              # c0
                pl.BlockSpec((IN_PAD, 4 * H), lambda b: (0, 0)),      # W_ih^T (resident)
                pl.BlockSpec((H, 4 * H), lambda b: (0, 0)),           # W_hh^T (resident)
                pl.BlockSpec((1, 4 * H), lambda b: (0, 0)),           # b_ih+b_hh
                pl.BlockSpec((H, OUT_PAD), lambda b: (0, 0)),         # W_lin^T (resident)
                pl.BlockSpec((1, OUT_PAD), lambda b: (0, 0)),         # b_lin (padded -1e30)
            ],
            out_specs=(
                pl.BlockSpec((S, tb, OUT_PAD), lambda b: (0, b, 0)),  # log-probs
                pl.BlockSpec((tb, H), lambda b: (b, 0)),              # h_n
                pl.BlockSpec((tb, H), lambda b: (b, 0)),              # c_n
            ),
            scratch_shapes=[
                pltpu.VMEM((S, tb, 4 * H), bf16),  # hoisted input-projection gates
                pltpu.VMEM((S, tb, H), bf16),      # all hidden states (for the head)
                pltpu.VMEM((tb, H), f32),          # running h (f32 accumulation)
                pltpu.VMEM((tb, H), f32),          # running c (f32 accumulation)
            ],
        ),
        compiler_params=pltpu.CompilerParams(
            dimension_semantics=("parallel",),     # batch tiles -> v7x 2nd TC
            vmem_limit_bytes=vmem_limit),
    )(x_p, h_p, c_p, w_ih_t, w_hh_t, bias, w_lin_t, b_lin)

    logp = logp_p[:, :B, :OUT]
    hn = h_out[:B].reshape(1, B, H)
    cn = c_out[:B].reshape(1, B, H)
    return logp, hn, cn


def lstm_reference(x, hidden, c, params):
    """Pure-JAX f32 reference matching PyTorch nn.LSTM + Linear + LogSoftmax."""
    H = params["w_hh"].shape[1]
    b = params["b_ih"] + params["b_hh"]

    def step(carry, xt):
        h, cc = carry
        gates = xt @ params["w_ih"].T + h @ params["w_hh"].T + b
        i = jax.nn.sigmoid(gates[:, 0 * H:1 * H])
        f = jax.nn.sigmoid(gates[:, 1 * H:2 * H])
        g = jnp.tanh(gates[:, 2 * H:3 * H])
        o = jax.nn.sigmoid(gates[:, 3 * H:4 * H])
        cc = f * cc + i * g
        h = o * jnp.tanh(cc)
        return (h, cc), h

    (hT, cT), hs = jax.lax.scan(step, (hidden[0], c[0]), x)
    logits = hs @ params["w_lin"].T + params["b_lin"]
    return jax.nn.log_softmax(logits, axis=-1), hT[None], cT[None]


def init_params(key, input_size, hidden_size, output_size):
    """Deterministic init matching PyTorch default U(-1/sqrt(H), 1/sqrt(H))."""
    k = jax.random.split(key, 6)
    s = 1.0 / jnp.sqrt(hidden_size)
    return {
        "w_ih": jax.random.uniform(k[0], (4 * hidden_size, input_size), jnp.float32, -s, s),
        "w_hh": jax.random.uniform(k[1], (4 * hidden_size, hidden_size), jnp.float32, -s, s),
        "b_ih": jax.random.uniform(k[2], (4 * hidden_size,), jnp.float32, -s, s),
        "b_hh": jax.random.uniform(k[3], (4 * hidden_size,), jnp.float32, -s, s),
        "w_lin": jax.random.uniform(k[4], (output_size, hidden_size), jnp.float32, -s, s),
        "b_lin": jax.random.uniform(k[5], (output_size,), jnp.float32, -s, s),
    }


def line_to_tensor(line):
    """One-hot (len(line), 1, n_letters), same as the PyTorch lineToTensor."""
    t = jnp.zeros((len(line), 1, N_LETTERS), jnp.float32)
    for li, letter in enumerate(line):
        t = t.at[li, 0, ALL_LETTERS.find(letter)].set(1.0)
    return t


if __name__ == "__main__":
    key = jax.random.PRNGKey(0)
    params = init_params(key, N_LETTERS, N_HIDDEN, OUTPUT_SIZE)

    line = "Bai"                               # the sequence from the script
    inp = line_to_tensor(line)                 # (3, 1, 57)
    hidden = jnp.zeros((1, 1, N_HIDDEN), jnp.float32)
    cell = jnp.zeros((1, 1, N_HIDDEN), jnp.float32)

    log_probs, hn, cn = lstm_forward(inp, hidden, cell, params)
    jax.block_until_ready((log_probs, hn, cn))

    assert log_probs.shape == (len(line), 1, OUTPUT_SIZE)
    assert hn.shape == (1, 1, N_HIDDEN) and cn.shape == (1, 1, N_HIDDEN)
    # log-softmax sanity: probabilities sum to 1 at every timestep.
    assert bool(jnp.allclose(jnp.sum(jnp.exp(log_probs), axis=-1), 1.0, atol=1e-3))

    # Numerics vs pure-JAX f32 reference (bf16 weights/scratch -> loose tolerance).
    ref_lp, ref_h, ref_c = lstm_reference(inp, hidden, cell, params)
    assert bool(jnp.allclose(log_probs, ref_lp, atol=5e-2, rtol=5e-2))
    assert bool(jnp.allclose(hn, ref_h, atol=5e-2))
    assert bool(jnp.allclose(cn, ref_c, atol=5e-2))

    print("KERNEL_OK")
</pallas_src>

<mosaic_0001>
module attributes {stable_mosaic.version = 11 : i64} {
  func.func @_lstm_seq_kernel(%arg0: i32, %arg1: memref<3x8x128xbf16, #tpu.memory_space<vmem>>, %arg2: memref<8x128xf32, #tpu.memory_space<vmem>>, %arg3: memref<8x128xf32, #tpu.memory_space<vmem>>, %arg4: memref<128x512xbf16, #tpu.memory_space<vmem>>, %arg5: memref<128x512xbf16, #tpu.memory_space<vmem>>, %arg6: memref<1x512xf32, #tpu.memory_space<vmem>>, %arg7: memref<128x128xbf16, #tpu.memory_space<vmem>>, %arg8: memref<1x128xf32, #tpu.memory_space<vmem>>, %arg9: memref<3x8x128xf32, #tpu.memory_space<vmem>>, %arg10: memref<8x128xf32, #tpu.memory_space<vmem>>, %arg11: memref<8x128xf32, #tpu.memory_space<vmem>>, %arg12: memref<3x8x512xbf16, #tpu.memory_space<vmem>>, %arg13: memref<3x8x128xbf16, #tpu.memory_space<vmem>>, %arg14: memref<8x128xf32, #tpu.memory_space<vmem>>, %arg15: memref<8x128xf32, #tpu.memory_space<vmem>>) attributes {dimension_semantics = [#tpu.dimension_semantics<parallel>], iteration_bounds = array<i64: 1>, scalar_prefetch = 0 : i64, scratch_operands = 4 : i64, tpu.core_type = #tpu.core_type<tc>, window_params = [{transform_indices = @transform_0, window_bounds = array<i64: 3, 8, 128>}, {transform_indices = @transform_1, window_bounds = array<i64: 8, 128>}, {transform_indices = @transform_2, window_bounds = array<i64: 8, 128>}, {pipeline_mode = #tpu.pipeline_mode<synchronous>, transform_indices = @transform_3, window_bounds = array<i64: 128, 512>}, {pipeline_mode = #tpu.pipeline_mode<synchronous>, transform_indices = @transform_4, window_bounds = array<i64: 128, 512>}, {pipeline_mode = #tpu.pipeline_mode<synchronous>, transform_indices = @transform_5, window_bounds = array<i64: 1, 512>}, {pipeline_mode = #tpu.pipeline_mode<synchronous>, transform_indices = @transform_6, window_bounds = array<i64: 128, 128>}, {pipeline_mode = #tpu.pipeline_mode<synchronous>, transform_indices = @transform_7, window_bounds = array<i64: 1, 128>}, {transform_indices = @transform_8, window_bounds = array<i64: 3, 8, 128>}, {transform_indices = @transform_9, window_bounds = array<i64: 8, 128>}, {transform_indices = @transform_10, window_bounds = array<i64: 8, 128>}]} {
    %c0 = arith.constant 0 : index
    %c0_0 = arith.constant 0 : index
    %c0_1 = arith.constant 0 : index
    %0 = vector.load %arg1[%c0, %c0_0, %c0_1] : memref<3x8x128xbf16, #tpu.memory_space<vmem>>, vector<3x8x128xbf16>
    %1 = vector.shape_cast %0 : vector<3x8x128xbf16> to vector<24x128xbf16>
    %c0_2 = arith.constant 0 : index
    %c0_3 = arith.constant 0 : index
    %2 = vector.load %arg4[%c0_2, %c0_3] : memref<128x512xbf16, #tpu.memory_space<vmem>>, vector<128x512xbf16>
    %cst = arith.constant dense<0.000000e+00> : vector<24x512xf32>
    %3 = tpu.matmul %1, %2, %cst {dimension_numbers = #tpu.dot_dimension_numbers<[1], [0], [0], [1], [0, 0, 1, 1], [], []>} : vector<24x128xbf16>, vector<128x512xbf16>, vector<24x512xf32> -> vector<24x512xf32>
    %c0_4 = arith.constant 0 : index
    %c0_5 = arith.constant 0 : index
    %4 = vector.load %arg6[%c0_4, %c0_5] : memref<1x512xf32, #tpu.memory_space<vmem>>, vector<1x512xf32>
    %5 = vector.broadcast %4 : vector<1x512xf32> to vector<24x512xf32>
    %6 = arith.addf %3, %5 : vector<24x512xf32>
    %7 = vector.shape_cast %6 : vector<24x512xf32> to vector<3x8x512xf32>
    %8 = arith.truncf %7 : vector<3x8x512xf32> to vector<3x8x512xbf16>
    %c0_6 = arith.constant 0 : index
    %c0_7 = arith.constant 0 : index
    %c0_8 = arith.constant 0 : index
    %9 = vector.load %arg12[%c0_6, %c0_7, %c0_8] : memref<3x8x512xbf16, #tpu.memory_space<vmem>>, vector<3x8x512xbf16>
    tpu.vector_store %arg12[%c0_6, %c0_7, %c0_8], %8 {strides = array<i32>} : memref<3x8x512xbf16, #tpu.memory_space<vmem>>, vector<3x8x512xbf16>,
    %c0_9 = arith.constant 0 : index
    %c0_10 = arith.constant 0 : index
    %10 = vector.load %arg2[%c0_9, %c0_10] : memref<8x128xf32, #tpu.memory_space<vmem>>, vector<8x128xf32>
    %c0_11 = arith.constant 0 : index
    %c0_12 = arith.constant 0 : index
    %11 = vector.load %arg14[%c0_11, %c0_12] : memref<8x128xf32, #tpu.memory_space<vmem>>, vector<8x128xf32>
    tpu.vector_store %arg14[%c0_11, %c0_12], %10 {strides = array<i32>} : memref<8x128xf32, #tpu.memory_space<vmem>>, vector<8x128xf32>,
    %c0_13 = arith.constant 0 : index
    %c0_14 = arith.constant 0 : index
    %12 = vector.load %arg3[%c0_13, %c0_14] : memref<8x128xf32, #tpu.memory_space<vmem>>, vector<8x128xf32>
    %c0_15 = arith.constant 0 : index
    %c0_16 = arith.constant 0 : index
    %13 = vector.load %arg15[%c0_15, %c0_16] : memref<8x128xf32, #tpu.memory_space<vmem>>, vector<8x128xf32>
    tpu.vector_store %arg15[%c0_15, %c0_16], %12 {strides = array<i32>} : memref<8x128xf32, #tpu.memory_space<vmem>>, vector<8x128xf32>,
    %c0_i32 = arith.constant 0 : i32
    %c0_17 = arith.constant 0 : index
    %c0_18 = arith.constant 0 : index
    %14 = vector.load %arg14[%c0_17, %c0_18] : memref<8x128xf32, #tpu.memory_space<vmem>>, vector<8x128xf32>
    %c0_19 = arith.constant 0 : index
    %c0_20 = arith.constant 0 : index
    %15 = vector.load %arg15[%c0_19, %c0_20] : memref<8x128xf32, #tpu.memory_space<vmem>>, vector<8x128xf32>
    %16 = arith.index_cast %c0_i32 : i32 to index
    %c0_21 = arith.constant 0 : index
    %c0_22 = arith.constant 0 : index
    %17 = vector.load %arg12[%16, %c0_21, %c0_22] : memref<3x8x512xbf16, #tpu.memory_space<vmem>>, vector<1x8x512xbf16>
    %18 = vector.shape_cast %17 : vector<1x8x512xbf16> to vector<8x512xbf16>
    %19 = arith.extf %18 : vector<8x512xbf16> to vector<8x512xf32>
    %20 = arith.truncf %14 : vector<8x128xf32> to vector<8x128xbf16>
    %c0_23 = arith.constant 0 : index
    %c0_24 = arith.constant 0 : index
    %21 = vector.load %arg5[%c0_23, %c0_24] : memref<128x512xbf16, #tpu.memory_space<vmem>>, vector<128x512xbf16>
    %cst_25 = arith.constant dense<0.000000e+00> : vector<8x512xf32>
    %22 = tpu.matmul %20, %21, %cst_25 {dimension_numbers = #tpu.dot_dimension_numbers<[1], [0], [0], [1], [0, 0, 1, 1], [], []>} : vector<8x128xbf16>, vector<128x512xbf16>, vector<8x512xf32> -> vector<8x512xf32>
    %23 = arith.addf %19, %22 : vector<8x512xf32>
    %24 = vector.extract_strided_slice %23 {offsets = [0, 0], sizes = [8, 384], strides = [1, 1]} : vector<8x512xf32> to vector<8x384xf32>
    %25 = arith.negf %24 : vector<8x384xf32>
    %26 = math.exp %25 : vector<8x384xf32>
    %cst_26 = arith.constant 1.000000e+00 : f32
    %27 = vector.broadcast %cst_26 : f32 to vector<8x384xf32>
    %28 = arith.addf %27, %26 : vector<8x384xf32>
    %29 = arith.divf %27, %28 : vector<8x384xf32>
    %30 = vector.extract_strided_slice %29 {offsets = [0, 0], sizes = [8, 128], strides = [1, 1]} : vector<8x384xf32> to vector<8x128xf32>
    %31 = vector.extract_strided_slice %29 {offsets = [0, 128], sizes = [8, 128], strides = [1, 1]} : vector<8x384xf32> to vector<8x128xf32>
    %32 = vector.extract_strided_slice %29 {offsets = [0, 256], sizes = [8, 128], strides = [1, 1]} : vector<8x384xf32> to vector<8x128xf32>
    %33 = vector.extract_strided_slice %23 {offsets = [0, 384], sizes = [8, 128], strides = [1, 1]} : vector<8x512xf32> to vector<8x128xf32>
    %34 = math.tanh %33 : vector<8x128xf32>
    %35 = arith.mulf %31, %15 : vector<8x128xf32>
    %36 = arith.mulf %30, %34 : vector<8x128xf32>
    %37 = arith.addf %35, %36 : vector<8x128xf32>
    %38 = math.tanh %37 : vector<8x128xf32>
    %39 = arith.mulf %32, %38 : vector<8x128xf32>
    %c0_27 = arith.constant 0 : index
    %c0_28 = arith.constant 0 : index
    %40 = vector.load %arg14[%c0_27, %c0_28] : memref<8x128xf32, #tpu.memory_space<vmem>>, vector<8x128xf32>
    tpu.vector_store %arg14[%c0_27, %c0_28], %39 {strides = array<i32>} : memref<8x128xf32, #tpu.memory_space<vmem>>, vector<8x128xf32>,
    %c0_29 = arith.constant 0 : index
    %c0_30 = arith.constant 0 : index
    %41 = vector.load %arg15[%c0_29, %c0_30] : memref<8x128xf32, #tpu.memory_space<vmem>>, vector<8x128xf32>
    tpu.vector_store %arg15[%c0_29, %c0_30], %37 {strides = array<i32>} : memref<8x128xf32, #tpu.memory_space<vmem>>, vector<8x128xf32>,
    %42 = arith.truncf %39 : vector<8x128xf32> to vector<8x128xbf16>
    %43 = arith.index_cast %c0_i32 : i32 to index
    %c0_31 = arith.constant 0 : index
    %c0_32 = arith.constant 0 : index
    %44 = vector.load %arg13[%43, %c0_31, %c0_32] : memref<3x8x128xbf16, #tpu.memory_space<vmem>>, vector<1x8x128xbf16>
    %45 = vector.shape_cast %44 : vector<1x8x128xbf16> to vector<8x128xbf16>
    %46 = vector.shape_cast %42 : vector<8x128xbf16> to vector<1x8x128xbf16>
    tpu.vector_store %arg13[%43, %c0_31, %c0_32], %46 {strides = array<i32>} : memref<3x8x128xbf16, #tpu.memory_space<vmem>>, vector<1x8x128xbf16>,
    %c1_i32 = arith.constant 1 : i32
    %c0_33 = arith.constant 0 : index
    %c0_34 = arith.constant 0 : index
    %47 = vector.load %arg14[%c0_33, %c0_34] : memref<8x128xf32, #tpu.memory_space<vmem>>, vector<8x128xf32>
    %c0_35 = arith.constant 0 : index
    %c0_36 = arith.constant 0 : index
    %48 = vector.load %arg15[%c0_35, %c0_36] : memref<8x128xf32, #tpu.memory_space<vmem>>, vector<8x128xf32>
    %49 = arith.index_cast %c1_i32 : i32 to index
    %c0_37 = arith.constant 0 : index
    %c0_38 = arith.constant 0 : index
    %50 = vector.load %arg12[%49, %c0_37, %c0_38] : memref<3x8x512xbf16, #tpu.memory_space<vmem>>, vector<1x8x512xbf16>
    %51 = vector.shape_cast %50 : vector<1x8x512xbf16> to vector<8x512xbf16>
    %52 = arith.extf %51 : vector<8x512xbf16> to vector<8x512xf32>
    %53 = arith.truncf %47 : vector<8x128xf32> to vector<8x128xbf16>
    %c0_39 = arith.constant 0 : index
    %c0_40 = arith.constant 0 : index
    %54 = vector.load %arg5[%c0_39, %c0_40] : memref<128x512xbf16, #tpu.memory_space<vmem>>, vector<128x512xbf16>
    %cst_41 = arith.constant dense<0.000000e+00> : vector<8x512xf32>
    %55 = tpu.matmul %53, %54, %cst_41 {dimension_numbers = #tpu.dot_dimension_numbers<[1], [0], [0], [1], [0, 0, 1, 1], [], []>} : vector<8x128xbf16>, vector<128x512xbf16>, vector<8x512xf32> -> vector<8x512xf32>
    %56 = arith.addf %52, %55 : vector<8x512xf32>
    %57 = vector.extract_strided_slice %56 {offsets = [0, 0], sizes = [8, 384], strides = [1, 1]} : vector<8x512xf32> to vector<8x384xf32>
    %58 = arith.negf %57 : vector<8x384xf32>
    %59 = math.exp %58 : vector<8x384xf32>
    %cst_42 = arith.constant 1.000000e+00 : f32
    %60 = vector.broadcast %cst_42 : f32 to vector<8x384xf32>
    %61 = arith.addf %60, %59 : vector<8x384xf32>
    %62 = arith.divf %60, %61 : vector<8x384xf32>
    %63 = vector.extract_strided_slice %62 {offsets = [0, 0], sizes = [8, 128], strides = [1, 1]} : vector<8x384xf32> to vector<8x128xf32>
    %64 = vector.extract_strided_slice %62 {offsets = [0, 128], sizes = [8, 128], strides = [1, 1]} : vector<8x384xf32> to vector<8x128xf32>
    %65 = vector.extract_strided_slice %62 {offsets = [0, 256], sizes = [8, 128], strides = [1, 1]} : vector<8x384xf32> to vector<8x128xf32>
    %66 = vector.extract_strided_slice %56 {offsets = [0, 384], sizes = [8, 128], strides = [1, 1]} : vector<8x512xf32> to vector<8x128xf32>
    %67 = math.tanh %66 : vector<8x128xf32>
    %68 = arith.mulf %64, %48 : vector<8x128xf32>
    %69 = arith.mulf %63, %67 : vector<8x128xf32>
    %70 = arith.addf %68, %69 : vector<8x128xf32>
    %71 = math.tanh %70 : vector<8x128xf32>
    %72 = arith.mulf %65, %71 : vector<8x128xf32>
    %c0_43 = arith.constant 0 : index
    %c0_44 = arith.constant 0 : index
    %73 = vector.load %arg14[%c0_43, %c0_44] : memref<8x128xf32, #tpu.memory_space<vmem>>, vector<8x128xf32>
    tpu.vector_store %arg14[%c0_43, %c0_44], %72 {strides = array<i32>} : memref<8x128xf32, #tpu.memory_space<vmem>>, vector<8x128xf32>,
    %c0_45 = arith.constant 0 : index
    %c0_46 = arith.constant 0 : index
    %74 = vector.load %arg15[%c0_45, %c0_46] : memref<8x128xf32, #tpu.memory_space<vmem>>, vector<8x128xf32>
    tpu.vector_store %arg15[%c0_45, %c0_46], %70 {strides = array<i32>} : memref<8x128xf32, #tpu.memory_space<vmem>>, vector<8x128xf32>,
    %75 = arith.truncf %72 : vector<8x128xf32> to vector<8x128xbf16>
    %76 = arith.index_cast %c1_i32 : i32 to index
    %c0_47 = arith.constant 0 : index
    %c0_48 = arith.constant 0 : index
    %77 = vector.load %arg13[%76, %c0_47, %c0_48] : memref<3x8x128xbf16, #tpu.memory_space<vmem>>, vector<1x8x128xbf16>
    %78 = vector.shape_cast %77 : vector<1x8x128xbf16> to vector<8x128xbf16>
    %79 = vector.shape_cast %75 : vector<8x128xbf16> to vector<1x8x128xbf16>
    tpu.vector_store %arg13[%76, %c0_47, %c0_48], %79 {strides = array<i32>} : memref<3x8x128xbf16, #tpu.memory_space<vmem>>, vector<1x8x128xbf16>,
    %c2_i32 = arith.constant 2 : i32
    %c0_49 = arith.constant 0 : index
    %c0_50 = arith.constant 0 : index
    %80 = vector.load %arg14[%c0_49, %c0_50] : memref<8x128xf32, #tpu.memory_space<vmem>>, vector<8x128xf32>
    %c0_51 = arith.constant 0 : index
    %c0_52 = arith.constant 0 : index
    %81 = vector.load %arg15[%c0_51, %c0_52] : memref<8x128xf32, #tpu.memory_space<vmem>>, vector<8x128xf32>
    %82 = arith.index_cast %c2_i32 : i32 to index
    %c0_53 = arith.constant 0 : index
    %c0_54 = arith.constant 0 : index
    %83 = vector.load %arg12[%82, %c0_53, %c0_54] : memref<3x8x512xbf16, #tpu.memory_space<vmem>>, vector<1x8x512xbf16>
    %84 = vector.shape_cast %83 : vector<1x8x512xbf16> to vector<8x512xbf16>
    %85 = arith.extf %84 : vector<8x512xbf16> to vector<8x512xf32>
    %86 = arith.truncf %80 : vector<8x128xf32> to vector<8x128xbf16>
    %c0_55 = arith.constant 0 : index
    %c0_56 = arith.constant 0 : index
    %87 = vector.load %arg5[%c0_55, %c0_56] : memref<128x512xbf16, #tpu.memory_space<vmem>>, vector<128x512xbf16>
    %cst_57 = arith.constant dense<0.000000e+00> : vector<8x512xf32>
    %88 = tpu.matmul %86, %87, %cst_57 {dimension_numbers = #tpu.dot_dimension_numbers<[1], [0], [0], [1], [0, 0, 1, 1], [], []>} : vector<8x128xbf16>, vector<128x512xbf16>, vector<8x512xf32> -> vector<8x512xf32>
    %89 = arith.addf %85, %88 : vector<8x512xf32>
    %90 = vector.extract_strided_slice %89 {offsets = [0, 0], sizes = [8, 384], strides = [1, 1]} : vector<8x512xf32> to vector<8x384xf32>
    %91 = arith.negf %90 : vector<8x384xf32>
    %92 = math.exp %91 : vector<8x384xf32>
    %cst_58 = arith.constant 1.000000e+00 : f32
    %93 = vector.broadcast %cst_58 : f32 to vector<8x384xf32>
    %94 = arith.addf %93, %92 : vector<8x384xf32>
    %95 = arith.divf %93, %94 : vector<8x384xf32>
    %96 = vector.extract_strided_slice %95 {offsets = [0, 0], sizes = [8, 128], strides = [1, 1]} : vector<8x384xf32> to vector<8x128xf32>
    %97 = vector.extract_strided_slice %95 {offsets = [0, 128], sizes = [8, 128], strides = [1, 1]} : vector<8x384xf32> to vector<8x128xf32>
    %98 = vector.extract_strided_slice %95 {offsets = [0, 256], sizes = [8, 128], strides = [1, 1]} : vector<8x384xf32> to vector<8x128xf32>
    %99 = vector.extract_strided_slice %89 {offsets = [0, 384], sizes = [8, 128], strides = [1, 1]} : vector<8x512xf32> to vector<8x128xf32>
    %100 = math.tanh %99 : vector<8x128xf32>
    %101 = arith.mulf %97, %81 : vector<8x128xf32>
    %102 = arith.mulf %96, %100 : vector<8x128xf32>
    %103 = arith.addf %101, %102 : vector<8x128xf32>
    %104 = math.tanh %103 : vector<8x128xf32>
    %105 = arith.mulf %98, %104 : vector<8x128xf32>
    %c0_59 = arith.constant 0 : index
    %c0_60 = arith.constant 0 : index
    %106 = vector.load %arg14[%c0_59, %c0_60] : memref<8x128xf32, #tpu.memory_space<vmem>>, vector<8x128xf32>
    tpu.vector_store %arg14[%c0_59, %c0_60], %105 {strides = array<i32>} : memref<8x128xf32, #tpu.memory_space<vmem>>, vector<8x128xf32>,
    %c0_61 = arith.constant 0 : index
    %c0_62 = arith.constant 0 : index
    %107 = vector.load %arg15[%c0_61, %c0_62] : memref<8x128xf32, #tpu.memory_space<vmem>>, vector<8x128xf32>
    tpu.vector_store %arg15[%c0_61, %c0_62], %103 {strides = array<i32>} : memref<8x128xf32, #tpu.memory_space<vmem>>, vector<8x128xf32>,
    %108 = arith.truncf %105 : vector<8x128xf32> to vector<8x128xbf16>
    %109 = arith.index_cast %c2_i32 : i32 to index
    %c0_63 = arith.constant 0 : index
    %c0_64 = arith.constant 0 : index
    %110 = vector.load %arg13[%109, %c0_63, %c0_64] : memref<3x8x128xbf16, #tpu.memory_space<vmem>>, vector<1x8x128xbf16>
    %111 = vector.shape_cast %110 : vector<1x8x128xbf16> to vector<8x128xbf16>
    %112 = vector.shape_cast %108 : vector<8x128xbf16> to vector<1x8x128xbf16>
    tpu.vector_store %arg13[%109, %c0_63, %c0_64], %112 {strides = array<i32>} : memref<3x8x128xbf16, #tpu.memory_space<vmem>>, vector<1x8x128xbf16>,
    %c3_i32 = arith.constant 3 : i32
    %c0_65 = arith.constant 0 : index
    %c0_66 = arith.constant 0 : index
    %c0_67 = arith.constant 0 : index
    %113 = vector.load %arg13[%c0_65, %c0_66, %c0_67] : memref<3x8x128xbf16, #tpu.memory_space<vmem>>, vector<3x8x128xbf16>
    %114 = vector.shape_cast %113 : vector<3x8x128xbf16> to vector<24x128xbf16>
    %c0_68 = arith.constant 0 : index
    %c0_69 = arith.constant 0 : index
    %115 = vector.load %arg7[%c0_68, %c0_69] : memref<128x128xbf16, #tpu.memory_space<vmem>>, vector<128x128xbf16>
    %cst_70 = arith.constant dense<0.000000e+00> : vector<24x128xf32>
    %116 = tpu.matmul %114, %115, %cst_70 {dimension_numbers = #tpu.dot_dimension_numbers<[1], [0], [0], [1], [0, 0, 1, 1], [], []>} : vector<24x128xbf16>, vector<128x128xbf16>, vector<24x128xf32> -> vector<24x128xf32>
    %117 = vector.shape_cast %116 : vector<24x128xf32> to vector<3x8x128xf32>
    %c0_71 = arith.constant 0 : index
    %c0_72 = arith.constant 0 : index
    %118 = vector.load %arg8[%c0_71, %c0_72] : memref<1x128xf32, #tpu.memory_space<vmem>>, vector<1x128xf32>
    %119 = vector.shape_cast %118 : vector<1x128xf32> to vector<1x1x128xf32>
    %120 = vector.broadcast %119 : vector<1x1x128xf32> to vector<3x8x128xf32>
    %121 = arith.addf %117, %120 : vector<3x8x128xf32>
    %cst_73 = arith.constant dense<0xFF800000> : vector<3x8xf32>
    %122 = vector.multi_reduction <maximumf>, %121, %cst_73 [2] : vector<3x8x128xf32> to vector<3x8xf32>
    %123 = vector.shape_cast %122 : vector<3x8xf32> to vector<3x8x1xf32>
    %124 = vector.broadcast %123 : vector<3x8x1xf32> to vector<3x8x128xf32>
    %125 = arith.subf %121, %124 : vector<3x8x128xf32>
    %126 = math.exp %125 : vector<3x8x128xf32>
    %cst_74 = arith.constant dense<0.000000e+00> : vector<3x8xf32>
    %127 = vector.multi_reduction <add>, %126, %cst_74 [2] : vector<3x8x128xf32> to vector<3x8xf32>
    %128 = vector.shape_cast %127 : vector<3x8xf32> to vector<3x8x1xf32>
    %129 = math.log %128 : vector<3x8x1xf32>
    %130 = vector.broadcast %129 : vector<3x8x1xf32> to vector<3x8x128xf32>
    %131 = arith.subf %125, %130 : vector<3x8x128xf32>
    %c0_75 = arith.constant 0 : index
    %c0_76 = arith.constant 0 : index
    %c0_77 = arith.constant 0 : index
    %132 = vector.load %arg9[%c0_75, %c0_76, %c0_77] : memref<3x8x128xf32, #tpu.memory_space<vmem>>, vector<3x8x128xf32>
    tpu.vector_store %arg9[%c0_75, %c0_76, %c0_77], %131 {strides = array<i32>} : memref<3x8x128xf32, #tpu.memory_space<vmem>>, vector<3x8x128xf32>,
    %c0_78 = arith.constant 0 : index
    %c0_79 = arith.constant 0 : index
    %133 = vector.load %arg14[%c0_78, %c0_79] : memref<8x128xf32, #tpu.memory_space<vmem>>, vector<8x128xf32>
    %c0_80 = arith.constant 0 : index
    %c0_81 = arith.constant 0 : index
    %134 = vector.load %arg10[%c0_80, %c0_81] : memref<8x128xf32, #tpu.memory_space<vmem>>, vector<8x128xf32>
    tpu.vector_store %arg10[%c0_80, %c0_81], %133 {strides = array<i32>} : memref<8x128xf32, #tpu.memory_space<vmem>>, vector<8x128xf32>,
    %c0_82 = arith.constant 0 : index
    %c0_83 = arith.constant 0 : index
    %135 = vector.load %arg15[%c0_82, %c0_83] : memref<8x128xf32, #tpu.memory_space<vmem>>, vector<8x128xf32>
    %c0_84 = arith.constant 0 : index
    %c0_85 = arith.constant 0 : index
    %136 = vector.load %arg11[%c0_84, %c0_85] : memref<8x128xf32, #tpu.memory_space<vmem>>, vector<8x128xf32>
    tpu.vector_store %arg11[%c0_84, %c0_85], %135 {strides = array<i32>} : memref<8x128xf32, #tpu.memory_space<vmem>>, vector<8x128xf32>,
    return
  }
  func.func @transform_0(%arg0: i32) -> (i32, i32, i32) {
    %c0_i32 = arith.constant 0 : i32
    %c0_i32_0 = arith.constant 0 : i32
    %c0_i32_1 = arith.constant 0 : i32
    return %c0_i32, %arg0, %c0_i32_0 : i32, i32, i32
  }
  func.func @transform_1(%arg0: i32) -> (i32, i32) {
    %c0_i32 = arith.constant 0 : i32
    %c0_i32_0 = arith.constant 0 : i32
    return %arg0, %c0_i32 : i32, i32
  }
  func.func @transform_2(%arg0: i32) -> (i32, i32) {
    %c0_i32 = arith.constant 0 : i32
    %c0_i32_0 = arith.constant 0 : i32
    return %arg0, %c0_i32 : i32, i32
  }
  func.func @transform_3(%arg0: i32) -> (i32, i32) {
    %c0_i32 = arith.constant 0 : i32
    %c0_i32_0 = arith.constant 0 : i32
    %c0_i32_1 = arith.constant 0 : i32
    return %c0_i32, %c0_i32_0 : i32, i32
  }
  func.func @transform_4(%arg0: i32) -> (i32, i32) {
    %c0_i32 = arith.constant 0 : i32
    %c0_i32_0 = arith.constant 0 : i32
    %c0_i32_1 = arith.constant 0 : i32
    return %c0_i32, %c0_i32_0 : i32, i32
  }
  func.func @transform_5(%arg0: i32) -> (i32, i32) {
    %c0_i32 = arith.constant 0 : i32
    %c0_i32_0 = arith.constant 0 : i32
    %c0_i32_1 = arith.constant 0 : i32
    return %c0_i32, %c0_i32_0 : i32, i32
  }
  func.func @transform_6(%arg0: i32) -> (i32, i32) {
    %c0_i32 = arith.constant 0 : i32
    %c0_i32_0 = arith.constant 0 : i32
    %c0_i32_1 = arith.constant 0 : i32
    return %c0_i32, %c0_i32_0 : i32, i32
  }
  func.func @transform_7(%arg0: i32) -> (i32, i32) {
    %c0_i32 = arith.constant 0 : i32
    %c0_i32_0 = arith.constant 0 : i32
    %c0_i32_1 = arith.constant 0 : i32
    return %c0_i32, %c0_i32_0 : i32, i32
  }
  func.func @transform_8(%arg0: i32) -> (i32, i32, i32) {
    %c0_i32 = arith.constant 0 : i32
    %c0_i32_0 = arith.constant 0 : i32
    %c0_i32_1 = arith.constant 0 : i32
    return %c0_i32, %arg0, %c0_i32_0 : i32, i32, i32
  }
  func.func @transform_9(%arg0: i32) -> (i32, i32) {
    %c0_i32 = arith.constant 0 : i32
    %c0_i32_0 = arith.constant 0 : i32
    return %arg0, %c0_i32 : i32, i32
  }
  func.func @transform_10(%arg0: i32) -> (i32, i32) {
    %c0_i32 = arith.constant 0 : i32
    %c0_i32_0 = arith.constant 0 : i32
    return %arg0, %c0_i32 : i32, i32
  }
}

</mosaic_0001>

<bundles_post_ra>
// kernel: lstm_forward.1
= control target key start
LH: loop header
LB: loop body
LE: loop exit
PB: predicated region body
PF: predicated region fallthrough
CT: control target
= control target key end

     0   :  { %s3185_s3 = inlined_call_operand.vmem [shape: bf16[128,512], index: 3, kind: input, shape index: {}]   ;;  %s3186_s4 = inlined_call_operand.vmem [shape: bf16[128,512], index: 4, kind: input, shape index: {}]   ;;  %s3187_s0 = inlined_call_operand.vmem [shape: bf16[3,8,128], index: 0, kind: input, shape index: {}]   ;;  %s3188_s1 = inlined_call_operand.vmem [shape: f32[8,128], index: 1, kind: input, shape index: {}]   ;;  %s3189_s5 = inlined_call_operand.vmem [shape: f32[1,512], index: 5, kind: input, shape index: {}]   ;;  %s3190_s2 = inlined_call_operand.vmem [shape: f32[8,128], index: 2, kind: input, shape index: {}]   ;;  %s3191_s6 = inlined_call_operand.vmem [shape: bf16[128,128], index: 6, kind: input, shape index: {}]   ;;  %s3192_s7 = inlined_call_operand.vmem [shape: f32[1,128], index: 7, kind: input, shape index: {}]   ;;  %s3193_s10 = inlined_call_operand.vmem [shape: f32[8,128], index: 10, kind: output, shape index: {2}]   ;;  %s3194_s9 = inlined_call_operand.vmem [shape: f32[8,128], index: 9, kind: output, shape index: {1}]   ;;  %s3195_s8 = inlined_call_operand.vmem [shape: f32[3,8,128], index: 8, kind: output, shape index: {0}]  }
   0x1   :  { %v1580_v0 = vld [vmem:[%s3185_s3 + $0xe0] sm:$0xf]  ;;  %v2054_v1 = vld [vmem:[%s3185_s3 + $0xec] sm:$0xf0]  ;;  %v1588_v2 = vld [vmem:[%s3185_s3 + $0xe8] sm:$0xf] }
   0x2   :  { %v1581_v3 = vor.u32 %v2054_v1, %v1580_v0  ;;  %v2055_v4 = vld [vmem:[%s3185_s3 + $0xf4] sm:$0xf0]  ;;  %v1564_v5 = vld [vmem:[%s3185_s3 + $0xc0] sm:$0xf]  ;;  %v2050_v6 = vld [vmem:[%s3185_s3 + $0xcc] sm:$0xf0] }
   0x3   :  { %v1589_v7 = vor.u32 %v2055_v4, %v1588_v2  ;;  %v1572_v8 = vld [vmem:[%s3185_s3 + $0xc8] sm:$0xf]  ;;  %v2051_v9 = vld [vmem:[%s3185_s3 + $0xd4] sm:$0xf0]  ;;  %v1565_v10 = vor.u32 %v2050_v6, %v1564_v5  ;;  %v1548_v11 = vld [vmem:[%s3185_s3 + $0xa0] sm:$0xf] }
   0x4   :  { %247 = vmatpush.bf16.msra.mxu1 %v1581_v3  ;;  %v1573_v12 = vor.u32 %v2051_v9, %v1572_v8  ;;  %v2046_v13 = vld [vmem:[%s3185_s3 + $0xac] sm:$0xf0]  ;;  %v2053_v14 = vld [vmem:[%s3185_s3 + $0xec] sm:$0xf]  ;;  %v1590_v15 = vld [vmem:[%s3185_s3 + $0xf8] sm:$0xf0] }
   0x5   :  { %283 = vmatpush.bf16.msra.mxu2 %v1589_v7  ;;  %v1556_v16 = vld [vmem:[%s3185_s3 + $0xa8] sm:$0xf]  ;;  %v2047_v17 = vld [vmem:[%s3185_s3 + $0xb4] sm:$0xf0]  ;;  %v1593_v18 = vor.u32 %v2053_v14, %v1590_v15  ;;  %v2049_v19 = vld [vmem:[%s3185_s3 + $0xcc] sm:$0xf]  ;;  %v1549_v21 = vor.u32 %v2046_v13, %v1548_v11 }
   0x6   :  { %v1574_v20 = vld [vmem:[%s3185_s3 + $0xd8] sm:$0xf0]  ;;  %v1532_v22 = vld [vmem:[%s3185_s3 + $0x80] sm:$0xf]  ;;  %v1557_v24 = vor.u32 %v2047_v17, %v1556_v16  ;;  %v2042_v25 = vld [vmem:[%s3185_s3 + $0x8c] sm:$0xf0] }
   0x7   :  { %301 = vmatpush.bf16.msra.mxu3 %v1593_v18  ;;  %v1577_v23 = vor.u32 %v2049_v19, %v1574_v20  ;;  %v2045_v26 = vld [vmem:[%s3185_s3 + $0xac] sm:$0xf]  ;;  %v1558_v27 = vld [vmem:[%s3185_s3 + $0xb8] sm:$0xf0]  ;;  %v1540_v28 = vld [vmem:[%s3185_s3 + $0x88] sm:$0xf]  ;;  %v1533_v30 = vor.u32 %v2042_v25, %v1532_v22 }
   0x8   :  { %248 = vmatpush.bf16.msra.mxu1 %v1565_v10  ;;  %v2043_v29 = vld [vmem:[%s3185_s3 + $0x94] sm:$0xf0]  ;;  %v1516_v31 = vld [vmem:[%s3185_s3 + $0x60] sm:$0xf]  ;;  %v1561_v32 = vor.u32 %v2045_v26, %v1558_v27  ;;  %v2038_v34 = vld [vmem:[%s3185_s3 + $0x6c] sm:$0xf0] }
   0x9   :  { %284 = vmatpush.bf16.msra.mxu2 %v1573_v12  ;;  %v1541_v33 = vor.u32 %v2043_v29, %v1540_v28  ;;  %v2041_v35 = vld [vmem:[%s3185_s3 + $0x8c] sm:$0xf]  ;;  %v1542_v36 = vld [vmem:[%s3185_s3 + $0x98] sm:$0xf0]  ;;  %v1524_v37 = vld [vmem:[%s3185_s3 + $0x68] sm:$0xf]  ;;  %v1517_v39 = vor.u32 %v2038_v34, %v1516_v31 }
   0xa   :  { %v2039_v38 = vld [vmem:[%s3185_s3 + $0x74] sm:$0xf0]  ;;  %v1500_v40 = vld [vmem:[%s3185_s3 + $0x40] sm:$0xf]  ;;  %v1545_v41 = vor.u32 %v2041_v35, %v1542_v36  ;;  %v2034_v43 = vld [vmem:[%s3185_s3 + $0x4c] sm:$0xf0] }
   0xb   :  { %302 = vmatpush.bf16.msra.mxu3 %v1577_v23  ;;  %v1525_v42 = vor.u32 %v2039_v38, %v1524_v37  ;;  %v2037_v44 = vld [vmem:[%s3185_s3 + $0x6c] sm:$0xf]  ;;  %v1526_v45 = vld [vmem:[%s3185_s3 + $0x78] sm:$0xf0]  ;;  %v1508_v46 = vld [vmem:[%s3185_s3 + $0x48] sm:$0xf]  ;;  %v1501_v50 = vor.u32 %v2034_v43, %v1500_v40 }
   0xc   :  { %249 = vmatpush.bf16.msra.mxu1 %v1549_v21  ;;  %v2035_v47 = vld [vmem:[%s3185_s3 + $0x54] sm:$0xf0]  ;;  %v1708_v48 = vld [vmem:[%s3186_s4 + $0xe0] sm:$0xf]  ;;  %v2086_v49 = vld [vmem:[%s3186_s4 + $0xec] sm:$0xf0]  ;;  %v1529_v53 = vor.u32 %v2037_v44, %v1526_v45 }
   0xd   :  { %285 = vmatpush.bf16.msra.mxu2 %v1557_v24  ;;  %v1484_v51 = vld [vmem:[%s3185_s3 + $0x20] sm:$0xf]  ;;  %v2030_v52 = vld [vmem:[%s3185_s3 + $0x2c] sm:$0xf0]  ;;  %v1709_v54 = vor.u32 %v2086_v49, %v1708_v48  ;;  %v1509_v55 = vor.u32 %v2035_v47, %v1508_v46  ;;  %v1492_v56 = vld [vmem:[%s3185_s3 + $0x28] sm:$0xf] }
   0xe   :  { %v2033_v57 = vld [vmem:[%s3185_s3 + $0x4c] sm:$0xf]  ;;  %v1510_v58 = vld [vmem:[%s3185_s3 + $0x58] sm:$0xf0]  ;;  %v2031_v59 = vld [vmem:[%s3185_s3 + $0x34] sm:$0xf0]  ;;  %v1485_v0 = vor.u32 %v2030_v52, %v1484_v51 }
   0xf   :  { %303 = vmatpush.bf16.msra.mxu3 %v1561_v32  ;;  %536 = vmatpush.bf16.msra.mxu0 %v1709_v54  ;;  %v1692_v60 = vld [vmem:[%s3186_s4 + $0xc0] sm:$0xf]  ;;  %v2082_v61 = vld [vmem:[%s3186_s4 + $0xcc] sm:$0xf0]  ;;  %v1476_v2 = vld [vmem:[%s3185_s3 + $0x8] sm:$0xf]  ;;  %v1513_v3 = vor.u32 %v2033_v57, %v1510_v58  ;;  %v1493_v5 = vor.u32 %v2031_v59, %v1492_v56 }
  0x10   :  { %250 = vmatpush.bf16.msra.mxu1 %v1533_v30  ;;  %v1468_v62 = vld [vmem:[%s3185_s3] sm:$0xf]  ;;  %v1693_v63 = vor.u32 %v2082_v61, %v1692_v60  ;;  %v2026_v1 = vld [vmem:[%s3185_s3 + $0xc] sm:$0xf0]  ;;  %v2029_v6 = vld [vmem:[%s3185_s3 + $0x2c] sm:$0xf] }
  0x11   :  { %286 = vmatpush.bf16.msra.mxu2 %v1541_v33  ;;  %v1676_v4 = vld [vmem:[%s3186_s4 + $0xa0] sm:$0xf]  ;;  %v1494_v7 = vld [vmem:[%s3185_s3 + $0x38] sm:$0xf0]  ;;  %v2078_v8 = vld [vmem:[%s3186_s4 + $0xac] sm:$0xf0]  ;;  %v1469_v16 = vor.u32 %v2026_v1, %v1468_v62 }
  0x12   :  { %v2027_v9 = vld [vmem:[%s3185_s3 + $0x14] sm:$0xf0]  ;;  %v2052_v10 = vld [vmem:[%s3185_s3 + $0xe4] sm:$0xf]  ;;  %v1582_v11 = vld [vmem:[%s3185_s3 + $0xf0] sm:$0xf0]  ;;  %v1677_v12 = vor.u32 %v2078_v8, %v1676_v4  ;;  %v1497_v18 = vor.u32 %v2029_v6, %v1494_v7 }
  0x13   :  { %304 = vmatpush.bf16.msra.mxu3 %v1545_v41  ;;  %537 = vmatpush.bf16.msra.mxu0 %v1693_v63  ;;  %v1716_v13 = vld [vmem:[%s3186_s4 + $0xe8] sm:$0xf]  ;;  %v2087_v14 = vld [vmem:[%s3186_s4 + $0xf4] sm:$0xf0]  ;;  %v1660_v15 = vld [vmem:[%s3186_s4 + $0x80] sm:$0xf]  ;;  %v1477_v20 = vor.u32 %v2027_v9, %v1476_v2  ;;  %v1585_v22 = vor.u32 %v2052_v10, %v1582_v11 }
  0x14   :  { %251 = vmatpush.bf16.msra.mxu1 %v1517_v39  ;;  %v2048_v17 = vld [vmem:[%s3185_s3 + $0xc4] sm:$0xf]  ;;  %v2074_v19 = vld [vmem:[%s3186_s4 + $0x8c] sm:$0xf0]  ;;  %v1566_v23 = vld [vmem:[%s3185_s3 + $0xd0] sm:$0xf0]  ;;  %v1717_v26 = vor.u32 %v2087_v14, %v1716_v13 }
  0x15   :  { %287 = vmatpush.bf16.msra.mxu2 %v1525_v42  ;;  %v2457_v21 = vld [vmem:[%s3187_s0] sm:$0xff]  ;;  %v2025_v24 = vld [vmem:[%s3185_s3 + $0xc] sm:$0xf]  ;;  %v1478_v25 = vld [vmem:[%s3185_s3 + $0x18] sm:$0xf0]  ;;  %v1661_v30 = vor.u32 %v2074_v19, %v1660_v15  ;;  %v1569_v35 = vor.u32 %v2048_v17, %v1566_v23 }
  0x16   :  { %v1700_v27 = vld [vmem:[%s3186_s4 + $0xc8] sm:$0xf]  ;;  %v2085_v28 = vld [vmem:[%s3186_s4 + $0xec] sm:$0xf]  ;;  %v1718_v29 = vld [vmem:[%s3186_s4 + $0xf8] sm:$0xf0]  ;;  %v1481_v34 = vor.u32 %v2025_v24, %v1478_v25 }
  0x17   :  { %305 = vmatpush.bf16.msra.mxu3 %v1529_v53  ;;  %538 = vmatpush.bf16.msra.mxu0 %v1677_v12  ;;  %v2083_v31 = vld [vmem:[%s3186_s4 + $0xd4] sm:$0xf0]  ;;  %v1644_v32 = vld [vmem:[%s3186_s4 + $0x60] sm:$0xf]  ;;  %v2070_v33 = vld [vmem:[%s3186_s4 + $0x6c] sm:$0xf0]  ;;  %v1721_v38 = vor.u32 %v2085_v28, %v1718_v29 }
  0x18   :  { %252 = vmatpush.bf16.msra.mxu1 %v1501_v50  ;;  %v2044_v36 = vld [vmem:[%s3185_s3 + $0xa4] sm:$0xf]  ;;  %v1550_v37 = vld [vmem:[%s3185_s3 + $0xb0] sm:$0xf0]  ;;  %v1701_v39 = vor.u32 %v2083_v31, %v1700_v27  ;;  %v1684_v40 = vld [vmem:[%s3186_s4 + $0xa8] sm:$0xf]  ;;  %v1645_v43 = vor.u32 %v2070_v33, %v1644_v32 }
  0x19   :  { %288 = vmatpush.bf16.msra.mxu2 %v1509_v55  ;;  %v2081_v41 = vld [vmem:[%s3186_s4 + $0xcc] sm:$0xf]  ;;  %v1702_v42 = vld [vmem:[%s3186_s4 + $0xd8] sm:$0xf0]  ;;  %v2079_v44 = vld [vmem:[%s3186_s4 + $0xb4] sm:$0xf0]  ;;  %v1553_v47 = vor.u32 %v2044_v36, %v1550_v37 }
  0x1a   :  { %v1628_v45 = vld [vmem:[%s3186_s4 + $0x40] sm:$0xf]  ;;  %v2066_v46 = vld [vmem:[%s3186_s4 + $0x4c] sm:$0xf0]  ;;  %v2040_v48 = vld [vmem:[%s3185_s3 + $0x84] sm:$0xf]  ;;  %v1705_v50 = vor.u32 %v2081_v41, %v1702_v42  ;;  %v1685_v51 = vor.u32 %v2079_v44, %v1684_v40 }
  0x1b   :  { %306 = vmatpush.bf16.msra.mxu3 %v1513_v3  ;;  %539 = vmatpush.bf16.msra.mxu0 %v1661_v30  ;;  %v1534_v49 = vld [vmem:[%s3185_s3 + $0x90] sm:$0xf0]  ;;  %v1668_v52 = vld [vmem:[%s3186_s4 + $0x88] sm:$0xf]  ;;  %v2077_v53 = vld [vmem:[%s3186_s4 + $0xac] sm:$0xf]  ;;  %v1629_v55 = vor.u32 %v2066_v46, %v1628_v45 }
  0x1c   :  { %253 = vmatpush.bf16.msra.mxu1 %v1485_v0  ;;  %v1686_v54 = vld [vmem:[%s3186_s4 + $0xb8] sm:$0xf0]  ;;  %v2075_v56 = vld [vmem:[%s3186_s4 + $0x94] sm:$0xf0]  ;;  %v1612_v57 = vld [vmem:[%s3186_s4 + $0x20] sm:$0xf]  ;;  %v1537_v60 = vor.u32 %v2040_v48, %v1534_v49 }
  0x1d   :  { %289 = vmatpush.bf16.msra.mxu2 %v1493_v5  ;;  %v2062_v58 = vld [vmem:[%s3186_s4 + $0x2c] sm:$0xf0]  ;;  %v34_v59 = vld [vmem:[%s3187_s0 + $0x8] sm:$0xf]  ;;  %v2036_v61 = vld [vmem:[%s3185_s3 + $0x64] sm:$0xf]  ;;  %v1689_v63 = vor.u32 %v2077_v53, %v1686_v54  ;;  %v1669_v0 = vor.u32 %v2075_v56, %v1668_v52 }
  0x1e   :  { %v1518_v62 = vld [vmem:[%s3185_s3 + $0x70] sm:$0xf0]  ;;  %v1652_v1 = vld [vmem:[%s3186_s4 + $0x68] sm:$0xf]  ;;  %v2073_v2 = vld [vmem:[%s3186_s4 + $0x8c] sm:$0xf]  ;;  %v1613_v4 = vor.u32 %v2062_v58, %v1612_v57  ;;  %v82_v5 = vunpack.c.l.b16 %v34_v59 }
  0x1f   :  { %307 = vmatpush.bf16.msra.mxu3 %v1497_v18  ;;  %540 = vmatpush.bf16.msra.mxu0 %v1645_v43  ;;  %v1670_v3 = vld [vmem:[%s3186_s4 + $0x98] sm:$0xf0]  ;;  %v2071_v6 = vld [vmem:[%s3186_s4 + $0x74] sm:$0xf0]  ;;  %v1596_v7 = vld [vmem:[%s3186_s4] sm:$0xf]  ;;  %v1521_v9 = vor.u32 %v2036_v61, %v1518_v62 }
  0x20   :  { %254 = vmatpush.bf16.msra.mxu1 %v1469_v16  ;;  %v2058_v8 = vld [vmem:[%s3186_s4 + $0xc] sm:$0xf0]  ;;  %v2032_v10 = vld [vmem:[%s3185_s3 + $0x44] sm:$0xf]  ;;  %v1673_v11 = vor.u32 %v2073_v2, %v1670_v3  ;;  %v1653_v12 = vor.u32 %v2071_v6, %v1652_v1  ;;  %v1502_v13 = vld [vmem:[%s3185_s3 + $0x50] sm:$0xf0]  ;;  %v2576_v17 = vpack.c.b16 %v82_v5, %v82_v5 }
  0x21   :  { %290 = vmatpush.bf16.msra.mxu2 %v1477_v20  ;;  %v2069_v14 = vld [vmem:[%s3186_s4 + $0x6c] sm:$0xf]  ;;  %v1654_v15 = vld [vmem:[%s3186_s4 + $0x78] sm:$0xf0]  ;;  %v1597_v16 = vor.u32 %v2058_v8, %v1596_v7  ;;  %v1636_v18 = vld [vmem:[%s3186_s4 + $0x48] sm:$0xf]  ;;  %v1505_v20 = vor.u32 %v2032_v10, %v1502_v13 }
  0x22   :  { %v2067_v19 = vld [vmem:[%s3186_s4 + $0x54] sm:$0xf0]  ;;  %v1657_v23 = vor.u32 %v2069_v14, %v1654_v15  ;;  %v331_v24 = vld [vmem:[%s3188_s1] sm:$0xff]  ;;  %v2065_v27 = vld [vmem:[%s3186_s4 + $0x4c] sm:$0xf] }
  0x23   :  { %255 = vmatmul.bf16.vlgmr.msra.gmra.mxu1 %v2457_v21  ;;  %308 = vmatpush.bf16.msra.mxu3 %v1481_v34  ;;  %v1637_v25 = vor.u32 %v2067_v19, %v1636_v18  ;;  %v1638_v28 = vld [vmem:[%s3186_s4 + $0x58] sm:$0xf0]  ;;  %v1620_v29 = vld [vmem:[%s3186_s4 + $0x28] sm:$0xf]  ;;  %v2063_v30 = vld [vmem:[%s3186_s4 + $0x34] sm:$0xf0]  ;;  %v2607_v31 = vpack.c.bf16 %v331_v24, %v331_v24 }
  0x24   :  { %265 = vmatpush.bf16.msrb.mxu1 %v1585_v22  ;;  %291 = vmatmul.bf16.vlgmr.msra.gmra.mxu2 %v2457_v21  ;;  %v2028_v22 = vld [vmem:[%s3185_s3 + $0x24] sm:$0xf]  ;;  %v1470_v34 = vld [vmem:[%s3185_s3 + $0x10] sm:$0xf0]  ;;  %v1621_v36 = vor.u32 %v2063_v30, %v1620_v29  ;;  %v1604_v37 = vld [vmem:[%s3186_s4 + $0x8] sm:$0xf] }
  0x25   :  { %562 = vmatpush.bf16.msrb.mxu2 %v1717_v26  ;;  %541 = vmatpush.bf16.msra.mxu0 %v1629_v55  ;;  %v1486_v26 = vld [vmem:[%s3185_s3 + $0x30] sm:$0xf0]  ;;  %v2024_v33 = vld [vmem:[%s3185_s3 + $0x4] sm:$0xf]  ;;  %v2059_v40 = vld [vmem:[%s3186_s4 + $0x14] sm:$0xf0] }
  0x26   :  { %309 = vmatmul.bf16.vlgmr.msra.gmra.mxu3 %v2457_v21  ;;  %v1489_v32 = vor.u32 %v2028_v22, %v1486_v26  ;;  %v2084_v41 = vld [vmem:[%s3186_s4 + $0xe4] sm:$0xf]  ;;  %v1710_v42 = vld [vmem:[%s3186_s4 + $0xf0] sm:$0xf0]  ;;  %v1473_v43 = vor.u32 %v2024_v33, %v1470_v34  ;;  %v1605_v45 = vor.u32 %v2059_v40, %v1604_v37  ;;  %v1606_v48 = vld [vmem:[%s3186_s4 + $0x18] sm:$0xf0] }
  0x27   :  { %575 = vmatpush.bf16.msrb.mxu3 %v1721_v38  ;;  %v2061_v38 = vld [vmem:[%s3186_s4 + $0x2c] sm:$0xf]  ;;  %v1713_v46 = vor.u32 %v2084_v41, %v1710_v42  ;;  %v2080_v49 = vld [vmem:[%s3186_s4 + $0xc4] sm:$0xf]  ;;  %v1678_v54 = vld [vmem:[%s3186_s4 + $0xb0] sm:$0xf0] }
  0x28   :  { %266 = vmatpush.bf16.msrb.mxu1 %v1569_v35  ;;  %v1641_v35 = vor.u32 %v2065_v27, %v1638_v28  ;;  %v2076_v53 = vld [vmem:[%s3186_s4 + $0xa4] sm:$0xf]  ;;  %v1662_v57 = vld [vmem:[%s3186_s4 + $0x90] sm:$0xf0]  ;;  %v67_v7 = vld [vmem:[%s3189_s5] sm:$0xf] }
  0x29   :  { %563 = vmatpush.bf16.msrb.mxu2 %v1701_v39  ;;  %542 = vmatpush.bf16.msra.mxu0 %v1613_v4  ;;  %v1622_v39 = vld [vmem:[%s3186_s4 + $0x38] sm:$0xf0]  ;;  %v1681_v55 = vor.u32 %v2076_v53, %v1678_v54  ;;  %v2072_v56 = vld [vmem:[%s3186_s4 + $0x84] sm:$0xf]  ;;  %v1630_v62 = vld [vmem:[%s3186_s4 + $0x50] sm:$0xf0] }
  0x2a   :  { %v1625_v44 = vor.u32 %v2061_v38, %v1622_v39  ;;  %v1665_v58 = vor.u32 %v2072_v56, %v1662_v57  ;;  %v2068_v59 = vld [vmem:[%s3186_s4 + $0x64] sm:$0xf]  ;;  %v1614_v1 = vld [vmem:[%s3186_s4 + $0x30] sm:$0xf0]  ;;  %v69_v8 = vperm.slane %v67_v7, 0  ;;  %v71_v13 = vperm.slane %v67_v7, 2 }
  0x2b   :  { %576 = vmatpush.bf16.msrb.mxu3 %v1705_v50  ;;  %v1694_v50 = vld [vmem:[%s3186_s4 + $0xd0] sm:$0xf0]  ;;  %v2064_v61 = vld [vmem:[%s3186_s4 + $0x44] sm:$0xf]  ;;  %v72_v18 = vperm.slane %v67_v7, 3  ;;  %v70_v30 = vperm.slane %v67_v7, 1 }
  0x2c   :  { %267 = vmatpush.bf16.msrb.mxu1 %v1553_v47  ;;  %v2057_v47 = vld [vmem:[%s3186_s4 + $0xc] sm:$0xf]  ;;  %v1697_v52 = vor.u32 %v2080_v49, %v1694_v50  ;;  %v2056_v3 = vld [vmem:[%s3186_s4 + $0x4] sm:$0xf]  ;;  %v1598_v4 = vld [vmem:[%s3186_s4 + $0x10] sm:$0xf0] }
  0x2d   :  { %564 = vmatpush.bf16.msrb.mxu2 %v1685_v51  ;;  %543 = vmatpush.bf16.msra.mxu0 %v1597_v16  ;;  %v1609_v51 = vor.u32 %v2057_v47, %v1606_v48  ;;  %v1601_v5 = vor.u32 %v2056_v3, %v1598_v4  ;;  %v1839_v47 = vld [vmem:[%s3186_s4 + $0xe0] sm:$0xf]  ;;  %v2118_v48 = vld [vmem:[%s3186_s4 + $0xec] sm:$0xf0]  ;;  %v2116_v49 = vld [vmem:[%s3186_s4 + $0xe4] sm:$0xf] }
  0x2e   :  { %v1840_v50 = vor.u32 %v2118_v48, %v1839_v47  ;;  %v2119_v53 = vld [vmem:[%s3186_s4 + $0xf4] sm:$0xf0]  ;;  %v1825_v3 = vld [vmem:[%s3186_s4 + $0xd0] sm:$0xf0] }
  0x2f   :  { %577 = vmatpush.bf16.msrb.mxu3 %v1689_v63  ;;  %v1633_v63 = vor.u32 %v2064_v61, %v1630_v62 }
  0x30   :  { %268 = vmatpush.bf16.msrb.mxu1 %v1537_v60  ;;  %544 = vmatmul.bf16.vlgmr.msra.gmra.mxu0 %v2607_v31 }
  0x31   :  { %565 = vmatpush.bf16.msrb.mxu2 %v1669_v0  ;;  %v2060_v0 = vld [vmem:[%s3186_s4 + $0x24] sm:$0xf]  ;;  %861 = vmatpush.bf16.msrb.mxu0 %v1840_v50  ;;  %v2102_v50 = vld [vmem:[%s3186_s4 + $0x6c] sm:$0xf0] }
  0x32   :  { %v1617_v2 = vor.u32 %v2060_v0, %v1614_v1  ;;  %v2114_v0 = vld [vmem:[%s3186_s4 + $0xcc] sm:$0xf0]  ;;  %v2112_v1 = vld [vmem:[%s3186_s4 + $0xc4] sm:$0xf] }
  0x33   :  { %578 = vmatpush.bf16.msrb.mxu3 %v1673_v11  ;;  %260 = vmatmul.bf16.gmra.mxu1 %v2576_v17  ;;  %v1828_v7 = vor.u32 %v2112_v1, %v1825_v3  ;;  %v1761_v3 = vld [vmem:[%s3186_s4 + $0x50] sm:$0xf0] }
  0x34   :  { %269 = vmatpush.bf16.msrb.mxu1 %v1521_v9  ;;  %296 = vmatmul.bf16.gmra.mxu2 %v2576_v17 }
  0x35   :  { %566 = vmatpush.bf16.msrb.mxu2 %v1653_v12 }
  0x36   :  { %314 = vmatmul.bf16.gmra.mxu3 %v2576_v17 }
  0x37   :  { %579 = vmatpush.bf16.msrb.mxu3 %v1657_v23 }
  0x38   :  { %270 = vmatpush.bf16.msrb.mxu1 %v1505_v20 }
  0x39   :  { %567 = vmatpush.bf16.msrb.mxu2 %v1637_v25 }
  0x3b   :  { %580 = vmatpush.bf16.msrb.mxu3 %v1641_v35 }
  0x3c   :  { %271 = vmatpush.bf16.msrb.mxu1 %v1489_v32 }
  0x3d   :  { %568 = vmatpush.bf16.msrb.mxu2 %v1621_v36 }
  0x3f   :  { %581 = vmatpush.bf16.msrb.mxu3 %v1625_v44 }
  0x40   :  { %272 = vmatpush.bf16.msrb.mxu1 %v1473_v43 }
  0x41   :  { %569 = vmatpush.bf16.msrb.mxu2 %v1605_v45 }
  0x43   :  { %582 = vmatpush.bf16.msrb.mxu3 %v1609_v51  ;;  %273 = vmatmul.bf16.vlgmr.msrb.gmra.mxu1 %v2457_v21  ;;  %v1646_v21 = vld [vmem:[%s3186_s4 + $0x70] sm:$0xf0] }
  0x44   :  { %549 = vmatpush.bf16.msra.mxu1 %v1713_v46  ;;  %570 = vmatmul.bf16.vlgmr.msrb.gmra.mxu2 %v2607_v31  ;;  %v1649_v60 = vor.u32 %v2068_v59, %v1646_v21  ;;  %v1841_v51 = vld [vmem:[%s3186_s4 + $0xf0] sm:$0xf0]  ;;  %v2117_v59 = vld [vmem:[%s3186_s4 + $0xec] sm:$0xf]  ;;  %v1849_v21 = vld [vmem:[%s3186_s4 + $0xf8] sm:$0xf0] }
  0x45   :  { %v1844_v57 = vor.u32 %v2116_v49, %v1841_v51  ;;  %v1852_v61 = vor.u32 %v2117_v59, %v1849_v21  ;;  %v1775_v49 = vld [vmem:[%s3186_s4 + $0x60] sm:$0xf]  ;;  %v2101_v59 = vld [vmem:[%s3186_s4 + $0x6c] sm:$0xf] }
  0x46   :  { %583 = vmatmul.bf16.vlgmr.msrb.gmra.mxu3 %v2607_v31  ;;  %v1776_v51 = vor.u32 %v2102_v50, %v1775_v49 }
  0x47   :  { %900 = vmatpush.bf16.msra.mxu3 %v1852_v61  ;;  %v1759_v61 = vld [vmem:[%s3186_s4 + $0x40] sm:$0xf] }
  0x48   :  { %550 = vmatpush.bf16.msra.mxu1 %v1697_v52  ;;  %v1847_v52 = vld [vmem:[%s3186_s4 + $0xe8] sm:$0xf] }
  0x4c   :  { %551 = vmatpush.bf16.msra.mxu1 %v1681_v55 }
  0x50   :  { %552 = vmatpush.bf16.msra.mxu1 %v1665_v58  ;;  %v1848_v58 = vor.u32 %v2119_v53, %v1847_v52  ;;  %v2100_v52 = vld [vmem:[%s3186_s4 + $0x64] sm:$0xf]  ;;  %v1777_v53 = vld [vmem:[%s3186_s4 + $0x70] sm:$0xf0] }
  0x52   :  { %887 = vmatpush.bf16.msra.mxu2 %v1848_v58  ;;  %v2103_v58 = vld [vmem:[%s3186_s4 + $0x74] sm:$0xf0] }
  0x53   :  { %278 = vmatmul.bf16.gmra.mxu1 %v2576_v17 }
  0x54   :  { %553 = vmatpush.bf16.msra.mxu1 %v1649_v60 }
  0x58   :  { %554 = vmatpush.bf16.msra.mxu1 %v1633_v63  ;;  %v1823_v63 = vld [vmem:[%s3186_s4 + $0xc0] sm:$0xf] }
  0x5c   :  { %555 = vmatpush.bf16.msra.mxu1 %v1617_v2  ;;  %v1824_v2 = vor.u32 %v2114_v0, %v1823_v63 }
  0x5e   :  { %862 = vmatpush.bf16.msrb.mxu0 %v1824_v2  ;;  %v2096_v2 = vld [vmem:[%s3186_s4 + $0x44] sm:$0xf] }
  0x60   :  { %556 = vmatpush.bf16.msra.mxu1 %v1601_v5 }
  0x63   :  { %557 = vmatmul.bf16.vlgmr.msra.gmra.mxu1 %v2607_v31 }
  0x64   :  { %874 = vmatpush.bf16.msrb.mxu1 %v1844_v57  ;;  %v1783_v57 = vld [vmem:[%s3186_s4 + $0x68] sm:$0xf] }
  0x68   :  { %875 = vmatpush.bf16.msrb.mxu1 %v1828_v7  ;;  %v2099_v7 = vld [vmem:[%s3186_s4 + $0x54] sm:$0xf0] }
  0xa0   :  { %v256_v6 = vpop.f32.mrf.mxu1 }
  0xa1   :  { %v257_v34 = vadd.f32 %v256_v6, %v69_v8 }
  0xa7   :  { %v292_v9 = vpop.f32.mrf.mxu2 }
  0xa8   :  { %v258_v10 = vpop.f32.mrf.mxu1  ;;  %v293_v43 = vadd.f32 %v292_v9, %v71_v13  ;;  %v2115_v9 = vld [vmem:[%s3186_s4 + $0xd4] sm:$0xf0] }
  0xa9   :  { %v259_v11 = vadd.f32 %v258_v10, %v69_v8  ;;  %v310_v12 = vpop.f32.mrf.mxu3  ;;  %v2113_v10 = vld [vmem:[%s3186_s4 + $0xcc] sm:$0xf] }
  0xaa   :  { %v311_v44 = vadd.f32 %v310_v12, %v72_v18  ;;  %v1807_v12 = vld [vmem:[%s3186_s4 + $0xa0] sm:$0xf] }
  0xac   :  { %v2720_v54 = vpack.c.bf16 %v311_v44, %v293_v43  ;;  %v2105_v43 = vld [vmem:[%s3186_s4 + $0x8c] sm:$0xf]  ;;  %v1801_v44 = vld [vmem:[%s3186_s4 + $0x98] sm:$0xf0] }
  0xad   :  { %v545_v22 = vpop.f32.mrf.mxu0  ;;  %v1804_v48 = vor.u32 %v2105_v43, %v1801_v44  ;;  %v1737_v43 = vld [vmem:[%s3186_s4 + $0x18] sm:$0xf0] }
  0xae   :  { %v341_v5 = vunpack.c.l.bf16 %v2720_v54 }
  0xaf   :  { %v294_v14 = vpop.f32.mrf.mxu2 }
  0xb0   :  { %v295_v15 = vadd.f32 %v294_v14, %v71_v13  ;;  %v261_v16 = vpop.f32.mrf.mxu1 }
  0xb1   :  { %v262_v17 = vadd.f32 %v261_v16, %v69_v8  ;;  %v312_v19 = vpop.f32.mrf.mxu3  ;;  %v1831_v8 = vld [vmem:[%s3186_s4 + $0xc8] sm:$0xf]  ;;  %v2108_v16 = vld [vmem:[%s3186_s4 + $0xa4] sm:$0xf] }
  0xb2   :  { %v313_v20 = vadd.f32 %v312_v19, %v72_v18  ;;  %v1809_v19 = vld [vmem:[%s3186_s4 + $0xb0] sm:$0xf0] }
  0xb4   :  { %v2691_v23 = vpack.c.bf16 %v313_v20, %v295_v15  ;;  %v2110_v15 = vld [vmem:[%s3186_s4 + $0xac] sm:$0xf0]  ;;  %v1815_v20 = vld [vmem:[%s3186_s4 + $0xa8] sm:$0xf] }
  0xb5   :  { %v547_v29 = vpop.f32.mrf.mxu0 }
  0xb7   :  { %v297_v24 = vpop.f32.mrf.mxu2 }
  0xb8   :  { %v298_v25 = vadd.f32 %v297_v24, %v71_v13  ;;  %v263_v26 = vpop.f32.mrf.mxu1  ;;  %v1832_v13 = vor.u32 %v2115_v9, %v1831_v8  ;;  %v1812_v24 = vor.u32 %v2108_v16, %v1809_v19  ;;  %v2097_v8 = vld [vmem:[%s3186_s4 + $0x4c] sm:$0xf]  ;;  %v1769_v9 = vld [vmem:[%s3186_s4 + $0x58] sm:$0xf0]  ;;  %v1745_v16 = vld [vmem:[%s3186_s4 + $0x30] sm:$0xf0] }
  0xb9   :  { %v315_v27 = vpop.f32.mrf.mxu3  ;;  %v2109_v26 = vld [vmem:[%s3186_s4 + $0xac] sm:$0xf] }
  0xba   :  { %v316_v28 = vadd.f32 %v315_v27, %v72_v18  ;;  %v1808_v18 = vor.u32 %v2110_v15, %v1807_v12  ;;  %888 = vmatpush.bf16.msra.mxu2 %v1832_v13  ;;  %v1817_v27 = vld [vmem:[%s3186_s4 + $0xb8] sm:$0xf0]  ;;  %876 = vmatpush.bf16.msrb.mxu1 %v1812_v24  ;;  %v2094_v12 = vld [vmem:[%s3186_s4 + $0x2c] sm:$0xf0]  ;;  %v2092_v15 = vld [vmem:[%s3186_s4 + $0x24] sm:$0xf] }
  0xbb   :  { %v1753_v24 = vld [vmem:[%s3186_s4 + $0x38] sm:$0xf0] }
  0xbc   :  { %v2693_v31 = vpack.c.bf16 %v316_v28, %v298_v25  ;;  %v2111_v25 = vld [vmem:[%s3186_s4 + $0xb4] sm:$0xf0]  ;;  %863 = vmatpush.bf16.msrb.mxu0 %v1808_v18 }
  0xbd   :  { %v1816_v29 = vor.u32 %v2111_v25, %v1815_v20  ;;  %v2095_v20 = vld [vmem:[%s3186_s4 + $0x34] sm:$0xf0] }
  0xbf   :  { %v299_v32 = vpop.f32.mrf.mxu2  ;;  %889 = vmatpush.bf16.msra.mxu2 %v1816_v29  ;;  %v2088_v29 = vld [vmem:[%s3186_s4 + $0x4] sm:$0xf] }
  0xc0   :  { %v274_v33 = vpop.f32.mrf.mxu1  ;;  %v1791_v32 = vld [vmem:[%s3186_s4 + $0x80] sm:$0xf] }
  0xc1   :  { %v275_v35 = vadd.f32 %v274_v33, %v70_v30  ;;  %v317_v36 = vpop.f32.mrf.mxu3  ;;  %v2106_v33 = vld [vmem:[%s3186_s4 + $0x8c] sm:$0xf0] }
  0xc2   :  { %v1793_v36 = vld [vmem:[%s3186_s4 + $0x90] sm:$0xf0] }
  0xc3   :  { %v2695_v37 = vpack.c.bf16 %v275_v35, %v257_v34  ;;  %v2104_v34 = vld [vmem:[%s3186_s4 + $0x84] sm:$0xf]  ;;  %v1792_v35 = vor.u32 %v2106_v33, %v1791_v32 }
  0xc5   :  { %v339_v38 = vunpack.c.l.bf16 %v2695_v37  ;;  %864 = vmatpush.bf16.msrb.mxu0 %v1792_v35 }
  0xc7   :  { %v571_v39 = vpop.f32.mrf.mxu2  ;;  %v588_v45 = vadd.f32 %v545_v22, %v339_v38  ;;  %v1799_v38 = vld [vmem:[%s3186_s4 + $0x88] sm:$0xf] }
  0xc8   :  { %v276_v40 = vpop.f32.mrf.mxu1 }
  0xc9   :  { %v277_v41 = vadd.f32 %v276_v40, %v70_v30  ;;  %v2698_v42 = vpop.f32.mrf.mxu3  ;;  %v1722_v55 = vmul.f32 -1.442695, %v588_v45  ;;  %865 = vmatpush.bf16.msrb.mxu0 %v1776_v51 }
  0xcb   :  { %v2700_v46 = vpack.c.bf16 %v277_v41, %v259_v11  ;;  %2162 = vpow2.f32 %v1722_v55  ;;  %v1833_v11 = vld [vmem:[%s3186_s4 + $0xd8] sm:$0xf0]  ;;  %v1796_v41 = vor.u32 %v2104_v34, %v1793_v36  ;;  %v340_v55 = vunpack.c.h.bf16 %v2695_v37  ;;  %v1735_v36 = vld [vmem:[%s3186_s4 + $0x8] sm:$0xf] }
  0xcc   :  { %v1836_v14 = vor.u32 %v2113_v10, %v1833_v11  ;;  %v1785_v37 = vld [vmem:[%s3186_s4 + $0x78] sm:$0xf0]  ;;  %v1743_v11 = vld [vmem:[%s3186_s4 + $0x20] sm:$0xf] }
  0xcd   :  { %877 = vmatpush.bf16.msrb.mxu1 %v1796_v41  ;;  %v1788_v0 = vor.u32 %v2101_v59, %v1785_v37  ;;  %v1744_v19 = vor.u32 %v2094_v12, %v1743_v11  ;;  %v2089_v41 = vld [vmem:[%s3186_s4 + $0xc] sm:$0xf] }
  0xce   :  { %901 = vmatpush.bf16.msra.mxu3 %v1836_v14  ;;  %v1772_v14 = vor.u32 %v2097_v8, %v1769_v9  ;;  %v1740_v50 = vor.u32 %v2089_v41, %v1737_v43  ;;  %v2151_v43 = vld [vmem:[%s3186_s4 + $0xf4] sm:$0xf0] }
  0xcf   :  { %v573_v56 = vpop.f32.mrf.mxu2 }
  0xd0   :  { %v279_v60 = vpop.f32.mrf.mxu1  ;;  %v1780_v56 = vor.u32 %v2100_v52, %v1777_v53  ;;  %v342_v52 = vunpack.c.h.bf16 %v2720_v54 }
  0xd1   :  { %v280_v62 = vadd.f32 %v279_v60, %v70_v30  ;;  %v586_v4 = vpop.f32.mrf.mxu3  ;;  %v2163_v28 = vpop.eup %2162  ;;  %v1820_v30 = vor.u32 %v2109_v26, %v1817_v27  ;;  %v1784_v60 = vor.u32 %v2103_v58, %v1783_v57  ;;  %v1748_v26 = vor.u32 %v2092_v15, %v1745_v16  ;;  %v1727_v27 = vld [vmem:[%s3186_s4] sm:$0xf] }
  0xd2   :  { %v2803_v45 = vadd.f32 1.0, %v2163_v28  ;;  %v1767_v4 = vld [vmem:[%s3186_s4 + $0x48] sm:$0xf]  ;;  %878 = vmatpush.bf16.msrb.mxu1 %v1780_v56  ;;  %v2090_v28 = vld [vmem:[%s3186_s4 + $0xc] sm:$0xf0]  ;;  %v591_v57 = vadd.f32 %v2698_v42, %v342_v52 }
  0xd3   :  { %v2741_v6 = vpack.c.bf16 %v280_v62, %v262_v17  ;;  %v590_v17 = vadd.f32 %v571_v39, %v341_v5  ;;  %v2107_v39 = vld [vmem:[%s3186_s4 + $0x94] sm:$0xf0]  ;;  %902 = vmatpush.bf16.msra.mxu3 %v1820_v30  ;;  %v2098_v62 = vld [vmem:[%s3186_s4 + $0x4c] sm:$0xf0]  ;;  %v1764_v5 = vor.u32 %v2096_v2, %v1761_v3  ;;  %v1768_v13 = vor.u32 %v2099_v7, %v1767_v4  ;;  %v1729_v30 = vld [vmem:[%s3186_s4 + $0x10] sm:$0xf0] }
  0xd4   :  { %v1800_v47 = vor.u32 %v2107_v39, %v1799_v38  ;;  %v1760_v1 = vor.u32 %v2098_v62, %v1759_v61  ;;  %v1728_v39 = vor.u32 %v2090_v28, %v1727_v27  ;;  %v1732_v44 = vor.u32 %v2088_v29, %v1729_v30  ;;  %v333_v4 = vld [vmem:[%s3190_s2] sm:$0xff]  ;;  %v2146_v28 = vld [vmem:[%s3186_s4 + $0xcc] sm:$0xf0] }
  0xd5   :  { %v1724_v40 = vmul.f32 -1.442695, %v590_v17  ;;  %v1751_v17 = vld [vmem:[%s3186_s4 + $0x28] sm:$0xf]  ;;  %vm609_vm1 = vweird.f32 %v2803_v45  ;;  %v613_v54 = vand.u32 2147483647, %v2803_v45 }
  0xd6   :  { %890 = vmatpush.bf16.msra.mxu2 %v1800_v47  ;;  %866 = vmatpush.bf16.msrb.mxu0 %v1760_v1  ;;  %v1752_v34 = vor.u32 %v2095_v20, %v1751_v17  ;;  %v1954_v27 = vld [vmem:[%s3186_s4 + $0xc0] sm:$0xf] }
  0xd7   :  { %2164 = vpow2.f32 %v1724_v40  ;;  %903 = vmatpush.bf16.msra.mxu3 %v1804_v48  ;;  %879 = vmatpush.bf16.msrb.mxu1 %v1764_v5  ;;  %v2091_v40 = vld [vmem:[%s3186_s4 + $0x14] sm:$0xf0]  ;;  %vm614_vm4 = vcmp.eq.f32.partialorder %v613_v54, 8.507059e+37  ;;  %v1955_v29 = vor.u32 %v2146_v28, %v1954_v27  ;;  %v1938_v30 = vld [vmem:[%s3186_s4 + $0xa0] sm:$0xf]  ;;  %v664_v28 = vunpack.c.l.bf16 %v2700_v46 }
  0xd8   :  { %v281_v22 = vpop.f32.mrf.mxu1  ;;  %2166 = vrcp.f32 %v2803_v45  ;;  %v1736_v49 = vor.u32 %v2091_v40, %v1735_v36  ;;  %v1978_v40 = vld [vmem:[%s3186_s4 + $0xe8] sm:$0xf] }
  0xd9   :  { %v2093_v22 = vld [vmem:[%s3186_s4 + $0x2c] sm:$0xf]  ;;  %v1914_v27 = vld [vmem:[%s3186_s4 + $0x68] sm:$0xf] }
  0xda   :  { %891 = vmatpush.bf16.msra.mxu2 %v1784_v60  ;;  %v1756_v35 = vor.u32 %v2093_v22, %v1753_v24  ;;  %867 = vmatpush.bf16.msrb.mxu0 %v1744_v19  ;;  %v615_v60 = vand.u32 2147483648, %v2803_v45  ;;  %v1970_v24 = vld [vmem:[%s3186_s4 + $0xe0] sm:$0xf] }
  0xdb   :  { %904 = vmatpush.bf16.msra.mxu3 %v1788_v0  ;;  %880 = vmatpush.bf16.msrb.mxu1 %v1748_v26 }
  0xdc   :  { %v616_v1 = vor.u32 1.1754944e-38, %v615_v60 }
  0xdd   :  { %v2165_v18 = vpop.eup %2164 }
  0xde   :  { %v2879_v25 = vpop.eup %2166  ;;  %v2893_v32 = vadd.f32 1.0, %v2165_v18  ;;  %892 = vmatpush.bf16.msra.mxu2 %v1768_v13  ;;  %868 = vmatpush.bf16.msrb.mxu0 %v1728_v39  ;;  %v1972_v39 = vld [vmem:[%s3186_s4 + $0xf0] sm:$0xf0] }
  0xdf   :  { %905 = vmatpush.bf16.msra.mxu3 %v1772_v14  ;;  %v605_v38 = vmul.f32 %v2879_v25, %v2803_v45  ;;  %881 = vmatpush.bf16.msrb.mxu1 %v1732_v44  ;;  %vm610_vm0 = vweird.f32 %v2879_v25  ;;  %v2149_v44 = vld [vmem:[%s3186_s4 + $0xec] sm:$0xf] }
  0xe0   :  { %v558_v21 = vpop.f32.mrf.mxu1  ;;  %vm611_vm2 = vmor %vm609_vm1, %vm610_vm0  ;;  %v645_v12 = vand.u32 2147483648, %v2893_v32  ;;  %vm639_vm8 = vweird.f32 %v2893_v32  ;;  %v643_v15 = vand.u32 2147483647, %v2893_v32 }
  0xe1   :  { %v589_v63 = vadd.f32 %v558_v21, %v340_v55  ;;  %v606_v51 = vsub.f32 1.0, %v605_v38  ;;  %v2148_v38 = vld [vmem:[%s3186_s4 + $0xe4] sm:$0xf] }
  0xe2   :  { %893 = vmatpush.bf16.msra.mxu2 %v1752_v34  ;;  %v646_v16 = vor.u32 1.1754944e-38, %v645_v12  ;;  %vm644_vm11 = vcmp.eq.f32.partialorder %v643_v15, 8.507059e+37  ;;  %v1922_v34 = vld [vmem:[%s3186_s4 + $0x80] sm:$0xf]  ;;  %v1975_v41 = vor.u32 %v2148_v38, %v1972_v39  ;;  %v1930_v12 = vld [vmem:[%s3186_s4 + $0x88] sm:$0xf] }
  0xe3   :  { %v1723_v10 = vmul.f32 -1.442695, %v589_v63  ;;  %906 = vmatpush.bf16.msra.mxu3 %v1756_v35  ;;  %v607_v53 = vmul.f32 %v2879_v25, %v606_v51  ;;  %v2138_v35 = vld [vmem:[%s3186_s4 + $0x8c] sm:$0xf0]  ;;  %v2139_v15 = vld [vmem:[%s3186_s4 + $0x94] sm:$0xf0] }
  0xe4   :  { %v1923_v36 = vor.u32 %v2138_v35, %v1922_v34  ;;  %1200 = vmatpush.bf16.msra.mxu1 %v1975_v41  ;;  %v2134_v51 = vld [vmem:[%s3186_s4 + $0x6c] sm:$0xf0]  ;;  %v1916_v34 = vld [vmem:[%s3186_s4 + $0x78] sm:$0xf0] }
  0xe5   :  { %2168 = vpow2.f32 %v1723_v10  ;;  %v608_v58 = vadd.f32 %v2879_v25, %v607_v53  ;;  %v2144_v53 = vld [vmem:[%s3186_s4 + $0xc4] sm:$0xf] }
  0xe6   :  { %2170 = vrcp.f32 %v2893_v32  ;;  %894 = vmatpush.bf16.msra.mxu2 %v1736_v49 }
  0xe7   :  { %907 = vmatpush.bf16.msra.mxu3 %v1740_v50  ;;  %v612_v62 = vsel %vm611_vm2, %v2879_v25, %v608_v58  ;;  %v2150_v25 = vld [vmem:[%s3186_s4 + $0xec] sm:$0xf0]  ;;  %v1906_v50 = vld [vmem:[%s3186_s4 + $0x60] sm:$0xf]  ;;  %v2147_v58 = vld [vmem:[%s3186_s4 + $0xd4] sm:$0xf0] }
  0xe8   :  { %v560_v33 = vpop.f32.mrf.mxu1  ;;  %v617_v3 = vsel %vm614_vm4, %v616_v1, %v612_v62  ;;  %v1971_v26 = vor.u32 %v2150_v25, %v1970_v24  ;;  %v1907_v52 = vor.u32 %v2134_v51, %v1906_v50  ;;  %v2132_v25 = vld [vmem:[%s3186_s4 + $0x64] sm:$0xf]  ;;  %v2131_v51 = vld [vmem:[%s3186_s4 + $0x54] sm:$0xf0] }
  0xea   :  { %1187 = vmatpush.bf16.msra.mxu0 %v1971_v26  ;;  %v1908_v26 = vld [vmem:[%s3186_s4 + $0x70] sm:$0xf0] }
  0xeb   :  { %v2169_v47 = vpop.eup %2168 }
  0xec   :  { %v602_v48 = vadd.f32 1.0, %v2169_v47  ;;  %v2171_v55 = vpop.eup %2170  ;;  %v1980_v47 = vld [vmem:[%s3186_s4 + $0xf8] sm:$0xf0] }
  0xed   :  { %v635_v21 = vmul.f32 %v2171_v55, %v2893_v32  ;;  %vm640_vm9 = vweird.f32 %v2171_v55  ;;  %v2142_v32 = vld [vmem:[%s3186_s4 + $0xac] sm:$0xf0]  ;;  %v1983_v49 = vor.u32 %v2149_v44, %v1980_v47  ;;  %v1892_v44 = vld [vmem:[%s3186_s4 + $0x50] sm:$0xf0]  ;;  %v1898_v47 = vld [vmem:[%s3186_s4 + $0x48] sm:$0xf] }
  0xee   :  { %2172 = vrcp.f32 %v602_v48  ;;  %v630_v61 = vand.u32 2147483648, %v602_v48  ;;  %v628_v63 = vand.u32 2147483647, %v602_v48  ;;  %vm624_vm5 = vweird.f32 %v602_v48  ;;  %vm641_vm10 = vmor %vm639_vm8, %vm640_vm9  ;;  %1188 = vmatpush.bf16.msra.mxu0 %v1955_v29 }
  0xef   :  { %2174 = vtanh.f32 %v591_v57  ;;  %v636_v0 = vsub.f32 1.0, %v635_v21  ;;  %v1939_v33 = vor.u32 %v2142_v32, %v1938_v30  ;;  %1226 = vmatpush.bf16.msrb.mxu3 %v1983_v49  ;;  %v1964_v21 = vld [vmem:[%s3186_s4 + $0xd8] sm:$0xf0]  ;;  %v665_v29 = vunpack.c.h.bf16 %v2700_v46  ;;  %v2135_v32 = vld [vmem:[%s3186_s4 + $0x74] sm:$0xf0] }
  0xf0   :  { %v631_v45 = vor.u32 1.1754944e-38, %v630_v61  ;;  %vm629_vm7 = vcmp.eq.f32.partialorder %v628_v63, 8.507059e+37  ;;  %v2130_v61 = vld [vmem:[%s3186_s4 + $0x4c] sm:$0xf0]  ;;  %v1940_v63 = vld [vmem:[%s3186_s4 + $0xb0] sm:$0xf0]  ;;  %v1911_v30 = vor.u32 %v2132_v25, %v1908_v26  ;;  %v1915_v38 = vor.u32 %v2135_v32, %v1914_v27 }
  0xf1   :  { %v637_v8 = vmul.f32 %v2171_v55, %v636_v0  ;;  %v1946_v0 = vld [vmem:[%s3186_s4 + $0xa8] sm:$0xf]  ;;  %v2160_v46 = vld [vmem:[%s3191_s6 + $0x38] sm:$0xff] }
  0xf2   :  { %1189 = vmatpush.bf16.msra.mxu0 %v1939_v33  ;;  %v2133_v33 = vld [vmem:[%s3186_s4 + $0x6c] sm:$0xf]  ;;  %v2156_v26 = vld [vmem:[%s3191_s6 + $0x18] sm:$0xff] }
  0xf3   :  { %v638_v14 = vadd.f32 %v2171_v55, %v637_v8  ;;  %v2126_v8 = vld [vmem:[%s3186_s4 + $0x2c] sm:$0xf0]  ;;  %v1919_v39 = vor.u32 %v2133_v33, %v1916_v34 }
  0xf4   :  { %v2173_v56 = vpop.eup %2172 }
  0xf5   :  { %v620_v59 = vmul.f32 %v2173_v56, %v602_v48  ;;  %vm625_vm3 = vweird.f32 %v2173_v56  ;;  %v2175_v7 = vpop.eup %2174  ;;  %v642_v17 = vsel %vm641_vm10, %v2171_v55, %v638_v14  ;;  %v1979_v48 = vor.u32 %v2151_v43, %v1978_v40  ;;  %v1956_v55 = vld [vmem:[%s3186_s4 + $0xd0] sm:$0xf0]  ;;  %v2128_v43 = vld [vmem:[%s3186_s4 + $0x44] sm:$0xf] }
  0xf6   :  { %vm626_vm6 = vmor %vm624_vm5, %vm625_vm3  ;;  %v651_v10 = vmul.f32 %v2175_v7, %v617_v3  ;;  %v647_v19 = vsel %vm644_vm11, %v646_v16, %v642_v17  ;;  %1190 = vmatpush.bf16.msra.mxu0 %v1923_v36  ;;  %v1959_v57 = vor.u32 %v2144_v53, %v1956_v55  ;;  %v2141_v3 = vld [vmem:[%s3186_s4 + $0xac] sm:$0xf]  ;;  %v1874_v7 = vld [vmem:[%s3186_s4 + $0x20] sm:$0xf]  ;;  %v1895_v50 = vor.u32 %v2128_v43, %v1892_v44 }
  0xf7   :  { %v621_v37 = vsub.f32 1.0, %v620_v59  ;;  %1213 = vmatpush.bf16.msrb.mxu2 %v1979_v48  ;;  %v2145_v59 = vld [vmem:[%s3186_s4 + $0xcc] sm:$0xf]  ;;  %v1932_v17 = vld [vmem:[%s3186_s4 + $0x98] sm:$0xf0] }
  0xf8   :  { %v1967_v54 = vor.u32 %v2145_v59, %v1964_v21  ;;  %1201 = vmatpush.bf16.msra.mxu1 %v1959_v57  ;;  %v2137_v16 = vld [vmem:[%s3186_s4 + $0x8c] sm:$0xf]  ;;  %v1900_v55 = vld [vmem:[%s3186_s4 + $0x58] sm:$0xf0]  ;;  %v1876_v59 = vld [vmem:[%s3186_s4 + $0x30] sm:$0xf0] }
  0xf9   :  { %v622_v42 = vmul.f32 %v2173_v56, %v621_v37  ;;  %v1890_v37 = vld [vmem:[%s3186_s4 + $0x40] sm:$0xf]  ;;  %v2129_v53 = vld [vmem:[%s3186_s4 + $0x4c] sm:$0xf]  ;;  %v1882_v21 = vld [vmem:[%s3186_s4 + $0x28] sm:$0xf] }
  0xfa   :  { %1191 = vmatpush.bf16.msra.mxu0 %v1907_v52  ;;  %1227 = vmatpush.bf16.msrb.mxu3 %v1967_v54  ;;  %v1891_v62 = vor.u32 %v2130_v61, %v1890_v37  ;;  %v1899_v52 = vor.u32 %v2131_v51, %v1898_v47  ;;  %v1903_v57 = vor.u32 %v2129_v53, %v1900_v55  ;;  %v2127_v37 = vld [vmem:[%s3186_s4 + $0x34] sm:$0xf0]  ;;  %v2125_v61 = vld [vmem:[%s3186_s4 + $0x2c] sm:$0xf] }
  0xfb   :  { %v623_v2 = vadd.f32 %v2173_v56, %v622_v42  ;;  %v2140_v42 = vld [vmem:[%s3186_s4 + $0xa4] sm:$0xf] }
  0xfc   :  { %v1943_v1 = vor.u32 %v2140_v42, %v1940_v63 }
  0xfd   :  { %v627_v5 = vsel %vm626_vm6, %v2173_v56, %v623_v2  ;;  %v1962_v56 = vld [vmem:[%s3186_s4 + $0xc8] sm:$0xf]  ;;  %v2143_v2 = vld [vmem:[%s3186_s4 + $0xb4] sm:$0xf0] }
  0xfe   :  { %v632_v9 = vsel %vm629_vm7, %v631_v45, %v627_v5  ;;  %v1963_v60 = vor.u32 %v2147_v58, %v1962_v56  ;;  %1192 = vmatpush.bf16.msra.mxu0 %v1891_v62  ;;  %v1947_v45 = vor.u32 %v2143_v2, %v1946_v0  ;;  %1202 = vmatpush.bf16.msra.mxu1 %v1943_v1  ;;  %v2159_v56 = vld [vmem:[%s3191_s6 + $0x30] sm:$0xff]  ;;  %v2124_v58 = vld [vmem:[%s3186_s4 + $0x24] sm:$0xf]  ;;  %v1884_v62 = vld [vmem:[%s3186_s4 + $0x38] sm:$0xf0] }
  0xff   :  { %v650_v11 = vmul.f32 %v632_v9, %v333_v4  ;;  %v1948_v4 = vld [vmem:[%s3186_s4 + $0xb8] sm:$0xf0]  ;;  %v1875_v9 = vor.u32 %v2126_v8, %v1874_v7  ;;  %v1879_v54 = vor.u32 %v2124_v58, %v1876_v59  ;;  %v1883_v0 = vor.u32 %v2127_v37, %v1882_v21  ;;  %v2158_v2 = vld [vmem:[%s3191_s6 + $0x28] sm:$0xff] }
 0x100   :  { %1214 = vmatpush.bf16.msrb.mxu2 %v1963_v60  ;;  %v1951_v5 = vor.u32 %v2141_v3, %v1948_v4  ;;  %v666_v60 = vunpack.c.l.bf16 %v2691_v23  ;;  %v1887_v1 = vor.u32 %v2125_v61, %v1884_v62  ;;  %v2120_v3 = vld [vmem:[%s3186_s4 + $0x4] sm:$0xf]  ;;  %v1860_v4 = vld [vmem:[%s3186_s4 + $0x10] sm:$0xf0]  ;;  %v1866_v8 = vld [vmem:[%s3186_s4 + $0x8] sm:$0xf] }
 0x101   :  { %v2924_v13 = vadd.f32 %v651_v10, %v650_v11  ;;  %v2136_v10 = vld [vmem:[%s3186_s4 + $0x84] sm:$0xf]  ;;  %v1924_v11 = vld [vmem:[%s3186_s4 + $0x90] sm:$0xf0] }
 0x102   :  { %1228 = vmatpush.bf16.msrb.mxu3 %v1951_v5  ;;  %v1927_v14 = vor.u32 %v2136_v10, %v1924_v11  ;;  %1193 = vmatpush.bf16.msra.mxu0 %v1875_v9  ;;  %v2123_v9 = vld [vmem:[%s3186_s4 + $0x14] sm:$0xf0]  ;;  %v2121_v10 = vld [vmem:[%s3186_s4 + $0xc] sm:$0xf]  ;;  %v1863_v11 = vor.u32 %v2120_v3, %v1860_v4 }
 0x103   :  { %2176 = vtanh.f32 %v2924_v13 }
 0x104   :  { %1215 = vmatpush.bf16.msrb.mxu2 %v1947_v45  ;;  %1203 = vmatpush.bf16.msra.mxu1 %v1927_v14 }
 0x108   :  { %1204 = vmatpush.bf16.msra.mxu1 %v1911_v30  ;;  %v2155_v30 = vld [vmem:[%s3191_s6 + $0x10] sm:$0xff] }
 0x109   :  { %v2177_v18 = vpop.eup %2176 }
 0x10a   :  { %v654_v20 = vmul.f32 %v2177_v18, %v647_v19  ;;  %v1931_v18 = vor.u32 %v2139_v15, %v1930_v12  ;;  %v1935_v19 = vor.u32 %v2137_v16, %v1932_v17  ;;  %v1868_v12 = vld [vmem:[%s3186_s4 + $0x18] sm:$0xf0]  ;;  %v1867_v15 = vor.u32 %v2123_v9, %v1866_v8 }
 0x10b   :  { %v1871_v17 = vor.u32 %v2121_v10, %v1868_v12  ;;  %v991_v8 = vunpack.c.h.bf16 %v2741_v6 }
 0x10c   :  { %v657_v22 = vpack.c.bf16 %v654_v20, %v654_v20  ;;  %v1858_v20 = vld [vmem:[%s3186_s4] sm:$0xf]  ;;  %1216 = vmatpush.bf16.msrb.mxu2 %v1931_v18  ;;  %1229 = vmatpush.bf16.msrb.mxu3 %v1935_v19 }
 0x10d   :  { %1205 = vmatpush.bf16.msra.mxu1 %v1895_v50  ;;  %v2157_v18 = vld [vmem:[%s3191_s6 + $0x20] sm:$0xff] }
 0x10e   :  { %658 = vst [vmem:[#allocation3] sm:$0xf] %v657_v22  ;;  %869 = vmatmul.bf16.vlgmr.msrb.gmra.mxu0 %v657_v22  ;;  %882 = vmatmul.bf16.vlgmr.msrb.gmra.mxu1 %v657_v22  ;;  %v2153_v50 = vld [vmem:[%s3191_s6] sm:$0xff] }
 0x10f   :  { %895 = vmatmul.bf16.vlgmr.msra.gmra.mxu2 %v657_v22  ;;  %908 = vmatmul.bf16.vlgmr.msra.gmra.mxu3 %v657_v22  ;;  %v2122_v22 = vld [vmem:[%s3186_s4 + $0xc] sm:$0xf0] }
 0x110   :  { %v1859_v24 = vor.u32 %v2122_v22, %v1858_v20  ;;  %1217 = vmatpush.bf16.msrb.mxu2 %v1915_v38  ;;  %1230 = vmatpush.bf16.msrb.mxu3 %v1919_v39  ;;  %v2154_v39 = vld [vmem:[%s3191_s6 + $0x8] sm:$0xff] }
 0x111   :  { %1206 = vmatpush.bf16.msra.mxu1 %v1879_v54 }
 0x112   :  { %1194 = vmatpush.bf16.msra.mxu0 %v1859_v24 }
 0x114   :  { %1218 = vmatpush.bf16.msrb.mxu2 %v1899_v52  ;;  %1231 = vmatpush.bf16.msrb.mxu3 %v1903_v57 }
 0x115   :  { %1207 = vmatpush.bf16.msra.mxu1 %v1863_v11 }
 0x116   :  { %1388 = vmatpush.bf16.msrb.mxu0 %v2160_v46 }
 0x118   :  { %1219 = vmatpush.bf16.msrb.mxu2 %v1883_v0  ;;  %1232 = vmatpush.bf16.msrb.mxu3 %v1887_v1 }
 0x11a   :  { %1389 = vmatpush.bf16.msrb.mxu0 %v2159_v56 }
 0x11c   :  { %1220 = vmatpush.bf16.msrb.mxu2 %v1867_v15  ;;  %1233 = vmatpush.bf16.msrb.mxu3 %v1871_v17 }
 0x11e   :  { %1390 = vmatpush.bf16.msrb.mxu0 %v2158_v2 }
 0x122   :  { %1391 = vmatpush.bf16.msrb.mxu0 %v2157_v18 }
 0x126   :  { %1392 = vmatpush.bf16.msrb.mxu0 %v2156_v26 }
 0x12a   :  { %1393 = vmatpush.bf16.msrb.mxu0 %v2155_v30 }
 0x12e   :  { %1394 = vmatpush.bf16.msrb.mxu0 %v2154_v39 }
 0x132   :  { %1395 = vmatpush.bf16.msrb.mxu0 %v2153_v50 }
 0x18b   :  { %v870_v35 = vpop.f32.mrf.mxu0  ;;  %v883_v36 = vpop.f32.mrf.mxu1 }
 0x18c   :  { %v913_v40 = vadd.f32 %v870_v35, %v664_v28  ;;  %v914_v41 = vadd.f32 %v883_v36, %v665_v29  ;;  %v667_v28 = vunpack.c.h.bf16 %v2691_v23 }
 0x18e   :  { %v1853_v48 = vmul.f32 -1.442695, %v913_v40  ;;  %v1854_v49 = vmul.f32 -1.442695, %v914_v41 }
 0x190   :  { %2178 = vpow2.f32 %v1853_v48 }
 0x191   :  { %2180 = vpow2.f32 %v1854_v49 }
 0x192   :  { %v896_v42 = vpop.f32.mrf.mxu2  ;;  %v909_v63 = vpop.f32.mrf.mxu3 }
 0x193   :  { %v915_v45 = vadd.f32 %v896_v42, %v666_v60  ;;  %v872_v5 = vpop.f32.mrf.mxu0  ;;  %v885_v7 = vpop.f32.mrf.mxu1  ;;  %v916_v33 = vadd.f32 %v909_v63, %v667_v28  ;;  %v3159_v28 = vld [vmem:[%s3192_s7] ss:$0 sm:$0xff] }
 0x194   :  { %v990_v7 = vunpack.c.l.bf16 %v2741_v6 }
 0x195   :  { %v1855_v14 = vmul.f32 -1.442695, %v915_v45 }
 0x196   :  { %v2179_v16 = vpop.eup %2178 }
 0x197   :  { %v2181_v19 = vpop.eup %2180  ;;  %v926_v20 = vadd.f32 1.0, %v2179_v16  ;;  %2182 = vpow2.f32 %v1855_v14  ;;  %v992_v16 = vunpack.c.l.bf16 %v2693_v31 }
 0x198   :  { %v927_v22 = vadd.f32 1.0, %v2181_v19 }
 0x199   :  { %2184 = vrcp.f32 %v926_v20  ;;  %v940_v23 = vand.u32 2147483648, %v926_v20  ;;  %v938_v43 = vand.u32 2147483647, %v926_v20  ;;  %vm934_vm14 = vweird.f32 %v926_v20 }
 0x19a   :  { %2186 = vrcp.f32 %v927_v22  ;;  %v898_v24 = vpop.f32.mrf.mxu2  ;;  %v911_v25 = vpop.f32.mrf.mxu3  ;;  %v955_v40 = vand.u32 2147483648, %v927_v22  ;;  %v953_v47 = vand.u32 2147483647, %v927_v22  ;;  %vm949_vm15 = vweird.f32 %v927_v22 }
 0x19b   :  { %v941_v52 = vor.u32 1.1754944e-38, %v940_v23  ;;  %vm939_vm2 = vcmp.eq.f32.partialorder %v938_v43, 8.507059e+37 }
 0x19c   :  { %v956_v55 = vor.u32 1.1754944e-38, %v955_v40  ;;  %vm954_vm3 = vcmp.eq.f32.partialorder %v953_v47, 8.507059e+37 }
 0x19d   :  { %v2183_v27 = vpop.eup %2182 }
 0x19e   :  { %v928_v29 = vadd.f32 1.0, %v2183_v27 }
 0x19f   :  { %v2185_v32 = vpop.eup %2184 }
 0x1a0   :  { %v2187_v34 = vpop.eup %2186  ;;  %v930_v35 = vmul.f32 %v2185_v32, %v926_v20  ;;  %2188 = vrcp.f32 %v928_v29  ;;  %vm935_vm12 = vweird.f32 %v2185_v32  ;;  %v970_v63 = vand.u32 2147483648, %v928_v29 }
 0x1a1   :  { %v945_v36 = vmul.f32 %v2187_v34, %v927_v22  ;;  %2190 = vtanh.f32 %v916_v33  ;;  %vm950_vm13 = vweird.f32 %v2187_v34  ;;  %vm936_vm0 = vmor %vm934_vm14, %vm935_vm12  ;;  %vm964_vm5 = vweird.f32 %v928_v29 }
 0x1a2   :  { %v931_v38 = vsub.f32 1.0, %v930_v35  ;;  %vm951_vm1 = vmor %vm949_vm15, %vm950_vm13  ;;  %v968_v0 = vand.u32 2147483647, %v928_v29  ;;  %v971_v2 = vor.u32 1.1754944e-38, %v970_v63  ;;  %v993_v35 = vunpack.c.h.bf16 %v2693_v31 }
 0x1a3   :  { %v946_v46 = vsub.f32 1.0, %v945_v36 }
 0x1a4   :  { %v932_v41 = vmul.f32 %v2185_v32, %v931_v38  ;;  %vm969_vm7 = vcmp.eq.f32.partialorder %v968_v0, 8.507059e+37 }
 0x1a5   :  { %v947_v44 = vmul.f32 %v2187_v34, %v946_v46 }
 0x1a6   :  { %v2189_v48 = vpop.eup %2188  ;;  %v933_v49 = vadd.f32 %v2185_v32, %v932_v41 }
 0x1a7   :  { %v960_v51 = vmul.f32 %v2189_v48, %v928_v29  ;;  %v948_v53 = vadd.f32 %v2187_v34, %v947_v44  ;;  %v2191_v57 = vpop.eup %2190  ;;  %vm965_vm4 = vweird.f32 %v2189_v48 }
 0x1a8   :  { %v937_v56 = vsel %vm936_vm0, %v2185_v32, %v933_v49  ;;  %vm966_vm6 = vmor %vm964_vm5, %vm965_vm4 }
 0x1a9   :  { %v961_v58 = vsub.f32 1.0, %v960_v51  ;;  %v942_v59 = vsel %vm939_vm2, %v941_v52, %v937_v56  ;;  %v952_v21 = vsel %vm951_vm1, %v2187_v34, %v948_v53 }
 0x1aa   :  { %v957_v60 = vsel %vm954_vm3, %v956_v55, %v952_v21  ;;  %v976_v54 = vmul.f32 %v2191_v57, %v942_v59 }
 0x1ab   :  { %v962_v37 = vmul.f32 %v2189_v48, %v961_v58  ;;  %v975_v61 = vmul.f32 %v957_v60, %v2924_v13 }
 0x1ad   :  { %v3150_v62 = vadd.f32 %v976_v54, %v975_v61  ;;  %v963_v42 = vadd.f32 %v2189_v48, %v962_v37 }
 0x1af   :  { %2192 = vtanh.f32 %v3150_v62  ;;  %v967_v1 = vsel %vm966_vm6, %v2189_v48, %v963_v42 }
 0x1b0   :  { %v972_v4 = vsel %vm969_vm7, %v971_v2, %v967_v1 }
 0x1b5   :  { %v2193_v3 = vpop.eup %2192 }
 0x1b6   :  { %v979_v45 = vmul.f32 %v2193_v3, %v972_v4 }
 0x1b8   :  { %v982_v5 = vpack.c.bf16 %v979_v45, %v979_v45 }
 0x1ba   :  { %984 = vst [vmem:[#allocation3 + $0x4] sm:$0xf] %v982_v5  ;;  %1195 = vmatmul.bf16.vlgmr.msra.gmra.mxu0 %v982_v5  ;;  %1208 = vmatmul.bf16.vlgmr.msra.gmra.mxu1 %v982_v5 }
 0x1bb   :  { %1221 = vmatmul.bf16.vlgmr.msrb.gmra.mxu2 %v982_v5  ;;  %1234 = vmatmul.bf16.vlgmr.msrb.gmra.mxu3 %v982_v5 }
 0x1c1   :  { %v2152_v13 = vld [vmem:[#allocation3] sm:$0xff] }
 0x1ca   :  { %1396 = vmatmul.bf16.vlgmr.msrb.gmra.mxu0 %v2152_v13 }
 0x237   :  { %v1196_v9 = vpop.f32.mrf.mxu0  ;;  %v1209_v10 = vpop.f32.mrf.mxu1 }
 0x238   :  { %v1239_v11 = vadd.f32 %v1196_v9, %v990_v7  ;;  %v1240_v12 = vadd.f32 %v1209_v10, %v991_v8 }
 0x23a   :  { %v1984_v14 = vmul.f32 -1.442695, %v1239_v11  ;;  %v1985_v15 = vmul.f32 -1.442695, %v1240_v12 }
 0x23c   :  { %2194 = vpow2.f32 %v1984_v14 }
 0x23d   :  { %2196 = vpow2.f32 %v1985_v15 }
 0x23e   :  { %v1222_v17 = vpop.f32.mrf.mxu2  ;;  %v1235_v18 = vpop.f32.mrf.mxu3 }
 0x23f   :  { %v1241_v19 = vadd.f32 %v1222_v17, %v992_v16  ;;  %v1198_v20 = vpop.f32.mrf.mxu0  ;;  %v1211_v22 = vpop.f32.mrf.mxu1  ;;  %v1242_v39 = vadd.f32 %v1235_v18, %v993_v35 }
 0x241   :  { %v1986_v24 = vmul.f32 -1.442695, %v1241_v19 }
 0x242   :  { %v2195_v25 = vpop.eup %2194 }
 0x243   :  { %v2197_v26 = vpop.eup %2196  ;;  %v1252_v27 = vadd.f32 1.0, %v2195_v25  ;;  %2198 = vpow2.f32 %v1986_v24 }
 0x244   :  { %v1253_v6 = vadd.f32 1.0, %v2197_v26 }
 0x245   :  { %2200 = vrcp.f32 %v1252_v27  ;;  %v1264_v44 = vand.u32 2147483647, %v1252_v27  ;;  %v1266_v47 = vand.u32 2147483648, %v1252_v27  ;;  %vm1260_vm10 = vweird.f32 %v1252_v27 }
 0x246   :  { %2202 = vrcp.f32 %v1253_v6  ;;  %v1224_v29 = vpop.f32.mrf.mxu2  ;;  %v1237_v30 = vpop.f32.mrf.mxu3  ;;  %v1281_v49 = vand.u32 2147483648, %v1253_v6  ;;  %v1279_v52 = vand.u32 2147483647, %v1253_v6  ;;  %vm1275_vm11 = vweird.f32 %v1253_v6 }
 0x247   :  { %v1397_v32 = vpop.f32.mrf.mxu0  ;;  %v1267_v57 = vor.u32 1.1754944e-38, %v1266_v47  ;;  %vm1265_vm14 = vcmp.eq.f32.partialorder %v1264_v44, 8.507059e+37 }
 0x248   :  { %v3162_v33 = vadd.f32 %v3159_v28, %v1397_v32  ;;  %v1282_v59 = vor.u32 1.1754944e-38, %v1281_v49  ;;  %vm1280_vm15 = vcmp.eq.f32.partialorder %v1279_v52, 8.507059e+37 }
 0x249   :  { %v2199_v34 = vpop.eup %2198 }
 0x24a   :  { %v1254_v36 = vadd.f32 1.0, %v2199_v34  ;;  %1413 = vmax.xlane.f32.xlu0 %v3162_v33 }
 0x24b   :  { %v2201_v38 = vpop.eup %2200 }
 0x24c   :  { %v2203_v46 = vpop.eup %2202  ;;  %v1256_v23 = vmul.f32 %v2201_v38, %v1252_v27  ;;  %2204 = vrcp.f32 %v1254_v36  ;;  %vm1261_vm8 = vweird.f32 %v2201_v38  ;;  %v1296_v4 = vand.u32 2147483648, %v1254_v36 }
 0x24d   :  { %v1271_v40 = vmul.f32 %v2203_v46, %v1253_v6  ;;  %2206 = vtanh.f32 %v1242_v39  ;;  %vm1276_vm9 = vweird.f32 %v2203_v46  ;;  %vm1262_vm12 = vmor %vm1260_vm10, %vm1261_vm8  ;;  %vm1290_vm1 = vweird.f32 %v1254_v36 }
 0x24e   :  { %v1257_v41 = vsub.f32 1.0, %v1256_v23  ;;  %vm1277_vm13 = vmor %vm1275_vm11, %vm1276_vm9  ;;  %v1294_v45 = vand.u32 2147483647, %v1254_v36  ;;  %v1297_v13 = vor.u32 1.1754944e-38, %v1296_v4 }
 0x24f   :  { %v1272_v43 = vsub.f32 1.0, %v1271_v40  ;;  %v1399_v48 = vpop.f32.mrf.mxu0 }
 0x250   :  { %v1258_v50 = vmul.f32 %v2201_v38, %v1257_v41  ;;  %v1411_v31 = vadd.f32 %v3159_v28, %v1399_v48  ;;  %vm1295_vm3 = vcmp.eq.f32.partialorder %v1294_v45, 8.507059e+37 }
 0x251   :  { %v1273_v51 = vmul.f32 %v2203_v46, %v1272_v43 }
 0x252   :  { %v2205_v53 = vpop.eup %2204  ;;  %v1259_v55 = vadd.f32 %v2201_v38, %v1258_v50  ;;  %1415 = vmax.xlane.f32.xlu0 %v1411_v31 }
 0x253   :  { %v1286_v56 = vmul.f32 %v2205_v53, %v1254_v36  ;;  %v1274_v58 = vadd.f32 %v2203_v46, %v1273_v51  ;;  %v2207_v60 = vpop.eup %2206  ;;  %vm1291_vm0 = vweird.f32 %v2205_v53 }
 0x254   :  { %v1263_v21 = vsel %vm1262_vm12, %v2201_v38, %v1259_v55  ;;  %vm1292_vm2 = vmor %vm1290_vm1, %vm1291_vm0 }
 0x255   :  { %v1287_v54 = vsub.f32 1.0, %v1286_v56  ;;  %v1268_v37 = vsel %vm1265_vm14, %v1267_v57, %v1263_v21  ;;  %v1278_v61 = vsel %vm1277_vm13, %v2203_v46, %v1274_v58 }
 0x256   :  { %v1283_v42 = vsel %vm1280_vm15, %v1282_v59, %v1278_v61  ;;  %v1302_v63 = vmul.f32 %v2207_v60, %v1268_v37 }
 0x257   :  { %v1288_v0 = vmul.f32 %v2205_v53, %v1287_v54  ;;  %v1301_v1 = vmul.f32 %v1283_v42, %v3150_v62 }
 0x259   :  { %v1303_v2 = vadd.f32 %v1302_v63, %v1301_v1  ;;  %v1289_v3 = vadd.f32 %v2205_v53, %v1288_v0 }
 0x25b   :  { %2208 = vtanh.f32 %v1303_v2  ;;  %1449 = vst [vmem:[%s3193_s10] sm:$0xff] %v1303_v2  ;;  %v1293_v5 = vsel %vm1292_vm2, %v2205_v53, %v1289_v3 }
 0x25c   :  { %v1298_v8 = vsel %vm1295_vm3, %v1297_v13, %v1293_v5 }
 0x261   :  { %v2209_v7 = vpop.eup %2208 }
 0x262   :  { %v1305_v9 = vmul.f32 %v2209_v7, %v1298_v8 }
 0x264   :  { %v1308_v10 = vpack.c.bf16 %v1305_v9, %v1305_v9  ;;  %1447 = vst [vmem:[%s3194_s9] sm:$0xff] %v1305_v9 }
 0x266   :  { %1310 = vst [vmem:[#allocation3 + $0x8] sm:$0xf] %v1308_v10 }
 0x26d   :  { %v1313_v62 = vld [vmem:[#allocation3 + $0x8] sm:$0xf] }
 0x26e   :  { %v1335_v11 = vunpack.c.l.b16 %v1313_v62 }
 0x270   :  { %v1337_v12 = vpack.c.b16 %v1335_v11, %v1335_v11 }
 0x272   :  { %1401 = vmatmul.bf16.gmra.mxu0 %v1337_v12 }
 0x2bd   :  { %v1414_v14 = vpop.xlane.xlu0 %1413 }
 0x2be   :  { %v1419_v19 = vsub.f32 %v3162_v33, %v1414_v14 }
 0x2c0   :  { %v1422_v20 = vmul.f32 1.442695, %v1419_v19 }
 0x2c5   :  { %v1416_v15 = vpop.xlane.xlu0 %1415 }
 0x2c6   :  { %v1420_v16 = vsub.f32 %v1411_v31, %v1416_v15 }
 0x2c8   :  { %v1424_v17 = vmul.f32 1.442695, %v1420_v16 }
 0x2ca   :  { %2210 = vpow2.f32 %v1424_v17 }
 0x2cb   :  { %2212 = vpow2.f32 %v1422_v20 }
 0x2d0   :  { %v2211_v18 = vpop.eup %2210 }
 0x2d1   :  { %1430 = vadd.xlane.f32.xlu2 %v2211_v18  ;;  %v2213_v26 = vpop.eup %2212 }
 0x2ef   :  { %v1402_v22 = vpop.f32.mrf.mxu0 }
 0x2f0   :  { %v1412_v24 = vadd.f32 %v3159_v28, %v1402_v22 }
 0x2f2   :  { %1417 = vmax.xlane.f32.xlu1 %v1412_v24 }
 0x2f7   :  { %v1404_v25 = vpop.f32.mrf.mxu0 }
 0x2fa   :  { %1428 = vadd.xlane.f32.xlu1 %v2213_v26 }
 0x344   :  { %v1431_v27 = vpop.xlane.xlu2 %1430 }
 0x345   :  { %2214 = vlog2.f32 %v1431_v27 }
 0x34b   :  { %v2215_v6 = vpop.eup %2214 }
 0x34c   :  { %v1437_v29 = vmul.f32 0.6931472, %v2215_v6 }
 0x34e   :  { %v1441_v30 = vsub.f32 %v1420_v16, %v1437_v29 }
 0x350   :  { %1444 = vst [vmem:[%s3195_s8 + $0x8] sm:$0xff] %v1441_v30 }
 0x365   :  { %v1418_v32 = vpop.xlane.xlu1 %1417 }
 0x366   :  { %v1421_v33 = vsub.f32 %v1412_v24, %v1418_v32 }
 0x368   :  { %v1426_v34 = vmul.f32 1.442695, %v1421_v33 }
 0x36a   :  { %2216 = vpow2.f32 %v1426_v34 }
 0x36d   :  { %v1429_v35 = vpop.xlane.xlu1 %1428 }
 0x36e   :  { %2218 = vlog2.f32 %v1429_v35 }
 0x370   :  { %v2217_v28 = vpop.eup %2216 }
 0x371   :  { %1432 = vadd.xlane.f32.xlu2 %v2217_v28 }
 0x374   :  { %v2219_v36 = vpop.eup %2218 }
 0x375   :  { %v1435_v38 = vmul.f32 0.6931472, %v2219_v36 }
 0x377   :  { %v1440_v39 = vsub.f32 %v1419_v19, %v1435_v38 }
 0x379   :  { %1443 = vst [vmem:[%s3195_s8] sm:$0xff] %v1440_v39 }
 0x3e4   :  { %v1433_v46 = vpop.xlane.xlu2 %1432 }
 0x3e5   :  { %2220 = vlog2.f32 %v1433_v46 }
 0x3eb   :  { %v2221_v23 = vpop.eup %2220 }
 0x3ec   :  { %v1439_v40 = vmul.f32 0.6931472, %v2221_v23 }
 0x3ee   :  { %v1442_v41 = vsub.f32 %v1421_v33, %v1439_v40 }
 0x3f0   :  { %1445 = vst [vmem:[%s3195_s8 + $0x10] sm:$0xff] %v1442_v41 }

</bundles_post_ra>
